<compile_context>
chip_gen: v7x
topology: tpu7x:2x2x1
jax: 0.10.0
libtpu: 0.0.40
codegen_flags: <defaults>
</compile_context>

<pallas_src>
import math
import jax
import jax.numpy as jnp
from jax.experimental import pallas as pl
from jax.experimental.pallas import tpu as pltpu

# ---- model hyper-parameters (small, consistent with the module) -------------
BATCH      = 2
SEQ        = 8
D_MODEL    = 32
N_HEADS    = 4
D_HEAD     = D_MODEL // N_HEADS
D_FF       = 64
NUM_LAYERS = 2
LN_EPS     = 1e-5


def _layer_norm(x, gamma, beta):
    # nn.LayerNorm semantics: biased variance over the last dim, eps=1e-5.
    mean = jnp.mean(x, axis=-1, keepdims=True)
    var = jnp.mean((x - mean) ** 2, axis=-1, keepdims=True)
    return (x - mean) * jax.lax.rsqrt(var + LN_EPS) * gamma + beta


# ----------------------------- fused encoder kernel ---------------------------
def _make_encoder_kernel(S, D, H, num_layers):
    Dh = D // H
    scale = 1.0 / math.sqrt(Dh)

    def kernel(x_ref, wqkv_ref, bqkv_ref, wo_ref, w1_ref, b1_ref, w2_ref,
               vec_ref, o_ref):
        # Layer-invariant parameters: loaded once, reused by every (shared) layer.
        wqkv = wqkv_ref[...]          # (D, 3D)  fused Wq|Wk|Wv
        bqkv = bqkv_ref[...]          # (1, 3D)  fused bq|bk|bv
        wo   = wo_ref[...]            # (D, D)
        w1, b1 = w1_ref[...], b1_ref[...]
        w2 = w2_ref[...]
        vec = vec_ref[...]            # (6, D): bo, b2, g1, be1, g2, be2
        bo, b2  = vec[0:1, :], vec[1:2, :]
        g1, be1 = vec[2:3, :], vec[3:4, :]
        g2, be2 = vec[4:5, :], vec[5:6, :]

        def one_layer(h):                                   # (S, D) -> (S, D)
            # --- fused QKV projection: ONE contract-D matmul + ONE bias add ---
            proj = jnp.dot(h, wqkv, preferred_element_type=jnp.float32) + bqkv

            # Head-major Q/K/V via cheap Dh-wide lane slices (vreg copies only).
            qkv = jnp.stack([proj[:, j * Dh:(j + 1) * Dh] for j in range(3 * H)],
                            axis=0)                         # (3H, S, Dh)
            q = qkv[0:H]                                    # (H, S, Dh)
            k = qkv[H:2 * H]
            v = qkv[2 * H:3 * H]

            # --- scaled dot-product attention, batched over ALL heads ---------
            # TODO(synk): optional attention `mask` / key-padding mask (forward
            # default is None) and dropout are not plumbed; eval-mode only.
            s = jnp.einsum("hqd,hkd->hqk", q, k,
                           preferred_element_type=jnp.float32) * scale
            s = s - jnp.max(s, axis=-1, keepdims=True)
            p = jnp.exp(s)
            p = p * pl.reciprocal(jnp.sum(p, axis=-1, keepdims=True),
                                  approx=True)
            ctx = jnp.einsum("hqk,hkd->hqd", p, v,
                             preferred_element_type=jnp.float32)   # (H, S, Dh)

            # --- output projection: ONE contract-D matmul ---------------------
            ctx2 = jnp.concatenate([ctx[j] for j in range(H)], axis=-1)  # (S, D)
            attn = jnp.dot(ctx2, wo, preferred_element_type=jnp.float32) + bo

            # --- residual + LayerNorm, FFN, residual + LayerNorm --------------
            y = _layer_norm(h + attn, g1, be1)
            hid = jnp.maximum(
                jnp.dot(y, w1, preferred_element_type=jnp.float32) + b1, 0.0)
            ff = jnp.dot(hid, w2, preferred_element_type=jnp.float32) + b2
            return _layer_norm(y + ff, g2, be2)

        h = x_ref[...]                                      # (S, D) this batch
        for _ in range(num_layers):      # shared-parameter layers, static unroll
            h = one_layer(h)
        o_ref[...] = h.astype(o_ref.dtype)

    return kernel


def build_encoder(B, S, D, F, H, num_layers):
    Dh = D // H
    param_shapes = [
        (D, 3 * D),        # fused Wq|Wk|Wv
        (1, 3 * D),        # fused bq|bk|bv
        (D, D),            # Wo
        (D, F), (1, F),    # W1, b1
        (F, D),            # W2
        (6, D),            # bo, b2, g1, be1, g2, be2
    ]

    def full(shape):
        n = len(shape)
        return pl.BlockSpec(shape, lambda b, n=n: (0,) * n)   # constant block

    x_spec   = pl.BlockSpec((S, D), lambda b: (b, 0))         # per-batch rows
    out_spec = pl.BlockSpec((S, D), lambda b: (b, 0))

    flops_layer = (2 * S * D * 3 * D            # fused QKV projection
                   + 2 * 2 * H * S * S * Dh     # scores + context
                   + 2 * S * D * D              # output projection
                   + 2 * 2 * S * D * F)         # FFN
    flops = B * num_layers * flops_layer
    transcendentals = B * num_layers * (H * S * S + H * S + 2 * S)
    bytes_accessed = 4 * (sum(math.prod(s) for s in param_shapes) + 2 * B * S * D)

    return pl.pallas_call(
        _make_encoder_kernel(S, D, H, num_layers),
        out_shape=jax.ShapeDtypeStruct((B * S, D), jnp.float32),
        grid_spec=pltpu.PrefetchScalarGridSpec(
            num_scalar_prefetch=0,
            grid=(B,),                 # batch-parallel: feeds both TCs on v7x
            in_specs=[x_spec] + [full(s) for s in param_shapes],
            out_specs=out_spec,
        ),
        compiler_params=pltpu.CompilerParams(
            dimension_semantics=("parallel",),
            vmem_limit_bytes=32 * 1024 * 1024,
        ),
        cost_estimate=pl.CostEstimate(
            flops=flops,
            transcendentals=transcendentals,
            bytes_accessed=bytes_accessed),
    )


# ---------------------------- parameters & packing ----------------------------
def init_params(key):
    ks = jax.random.split(key, 12)

    def w(k, fi, fo):
        lim = 1.0 / math.sqrt(fi)
        return jax.random.uniform(k, (fi, fo), jnp.float32, -lim, lim)

    def b(k, fi, n):
        lim = 1.0 / math.sqrt(fi)
        return jax.random.uniform(k, (n,), jnp.float32, -lim, lim)

    return {
        "wq": w(ks[0], D_MODEL, D_MODEL), "bq": b(ks[6], D_MODEL, D_MODEL),
        "wk": w(ks[1], D_MODEL, D_MODEL), "bk": b(ks[7], D_MODEL, D_MODEL),
        "wv": w(ks[2], D_MODEL, D_MODEL), "bv": b(ks[8], D_MODEL, D_MODEL),
        "wo": w(ks[3], D_MODEL, D_MODEL), "bo": b(ks[9], D_MODEL, D_MODEL),
        "w1": w(ks[4], D_MODEL, D_FF),    "b1": b(ks[10], D_MODEL, D_FF),
        "w2": w(ks[5], D_FF, D_MODEL),    "b2": b(ks[11], D_FF, D_MODEL),
        "g1": jnp.ones((D_MODEL,), jnp.float32),
        "be1": jnp.zeros((D_MODEL,), jnp.float32),
        "g2": jnp.ones((D_MODEL,), jnp.float32),
        "be2": jnp.zeros((D_MODEL,), jnp.float32),
    }


def pack_params(p):
    # Fused QKV: columns [Wq | Wk | Wv] -> one (D, 3D) matmul per layer.
    wqkv = jnp.concatenate([p["wq"], p["wk"], p["wv"]], axis=1)           # (D, 3D)
    bqkv = jnp.concatenate([p["bq"], p["bk"], p["bv"]],
                           axis=0).reshape(1, 3 * D_MODEL)                # (1, 3D)
    vec = jnp.stack([p["bo"], p["b2"], p["g1"], p["be1"], p["g2"], p["be2"]],
                    axis=0)                                               # (6, D)
    return (wqkv, bqkv, p["wo"], p["w1"], p["b1"].reshape(1, D_FF),
            p["w2"], vec)


def transformer_encoder(src, params, num_layers=NUM_LAYERS):
    """Matches `TransformerEncoder.forward`: the SAME layer (shared params)
    applied `num_layers` times — all fused into a single pallas_call."""
    B, S, D = src.shape
    enc = build_encoder(B, S, D, D_FF, N_HEADS, num_layers)
    out_flat = enc(src.reshape(B * S, D), *pack_params(params))
    return out_flat.reshape(B, S, D)


# ---------------------------- pure-JAX reference ------------------------------
def _ref_layer(x, p):
    q = x @ p["wq"] + p["bq"]
    k = x @ p["wk"] + p["bk"]
    v = x @ p["wv"] + p["bv"]
    B, S, D = x.shape

    def split(t):  # (B,S,D) -> (B,H,S,Dh)
        return t.reshape(B, S, N_HEADS, D_HEAD).transpose(0, 2, 1, 3)

    qh, kh, vh = split(q), split(k), split(v)
    s = jnp.einsum("bhqd,bhkd->bhqk", qh, kh) / math.sqrt(D_HEAD)
    a = jnp.einsum("bhqk,bhkd->bhqd", jax.nn.softmax(s, axis=-1), vh)
    a = a.transpose(0, 2, 1, 3).reshape(B, S, D) @ p["wo"] + p["bo"]
    y = _layer_norm(x + a, p["g1"], p["be1"])
    ff = jnp.maximum(y @ p["w1"] + p["b1"], 0.0) @ p["w2"] + p["b2"]
    return _layer_norm(y + ff, p["g2"], p["be2"])


def _ref_encoder(x, p, n):
    for _ in range(n):
        x = _ref_layer(x, p)
    return x


if __name__ == "__main__":
    key = jax.random.PRNGKey(0)
    k_x, k_p = jax.random.split(key)
    src = jax.random.normal(k_x, (BATCH, SEQ, D_MODEL), jnp.float32)
    params = init_params(k_p)

    out = transformer_encoder(src, params, NUM_LAYERS)
    out = jax.block_until_ready(out)

    ref = _ref_encoder(src, params, NUM_LAYERS)
    assert out.shape == (BATCH, SEQ, D_MODEL)
    # Tolerance accounts for the EUP approximate reciprocal in the softmax.
    assert jnp.allclose(out, ref, atol=5e-3, rtol=5e-3)

    print("KERNEL_OK")
</pallas_src>

<mosaic_0001>
module attributes {stable_mosaic.version = 11 : i64} {
  func.func @kernel(%arg0: i32, %arg1: memref<8x32xf32, #tpu.memory_space<vmem>>, %arg2: memref<32x96xf32, #tpu.memory_space<vmem>>, %arg3: memref<1x96xf32, #tpu.memory_space<vmem>>, %arg4: memref<32x32xf32, #tpu.memory_space<vmem>>, %arg5: memref<32x64xf32, #tpu.memory_space<vmem>>, %arg6: memref<1x64xf32, #tpu.memory_space<vmem>>, %arg7: memref<64x32xf32, #tpu.memory_space<vmem>>, %arg8: memref<6x32xf32, #tpu.memory_space<vmem>>, %arg9: memref<8x32xf32, #tpu.memory_space<vmem>>) attributes {dimension_semantics = [#tpu.dimension_semantics<parallel>], iteration_bounds = array<i64: 2>, scalar_prefetch = 0 : i64, scratch_operands = 0 : i64, tpu.core_type = #tpu.core_type<tc>, window_params = [{transform_indices = @transform_0, window_bounds = array<i64: 8, 32>}, {pipeline_mode = #tpu.pipeline_mode<synchronous>, transform_indices = @transform_1, window_bounds = array<i64: 32, 96>}, {pipeline_mode = #tpu.pipeline_mode<synchronous>, transform_indices = @transform_2, window_bounds = array<i64: 1, 96>}, {pipeline_mode = #tpu.pipeline_mode<synchronous>, transform_indices = @transform_3, window_bounds = array<i64: 32, 32>}, {pipeline_mode = #tpu.pipeline_mode<synchronous>, transform_indices = @transform_4, window_bounds = array<i64: 32, 64>}, {pipeline_mode = #tpu.pipeline_mode<synchronous>, transform_indices = @transform_5, window_bounds = array<i64: 1, 64>}, {pipeline_mode = #tpu.pipeline_mode<synchronous>, transform_indices = @transform_6, window_bounds = array<i64: 64, 32>}, {pipeline_mode = #tpu.pipeline_mode<synchronous>, transform_indices = @transform_7, window_bounds = array<i64: 6, 32>}, {transform_indices = @transform_8, window_bounds = array<i64: 8, 32>}]} {
    %c0 = arith.constant 0 : index
    %c0_0 = arith.constant 0 : index
    %0 = vector.load %arg2[%c0, %c0_0] : memref<32x96xf32, #tpu.memory_space<vmem>>, vector<32x96xf32>
    %c0_1 = arith.constant 0 : index
    %c0_2 = arith.constant 0 : index
    %1 = vector.load %arg3[%c0_1, %c0_2] : memref<1x96xf32, #tpu.memory_space<vmem>>, vector<1x96xf32>
    %c0_3 = arith.constant 0 : index
    %c0_4 = arith.constant 0 : index
    %2 = vector.load %arg4[%c0_3, %c0_4] : memref<32x32xf32, #tpu.memory_space<vmem>>, vector<32x32xf32>
    %c0_5 = arith.constant 0 : index
    %c0_6 = arith.constant 0 : index
    %3 = vector.load %arg5[%c0_5, %c0_6] : memref<32x64xf32, #tpu.memory_space<vmem>>, vector<32x64xf32>
    %c0_7 = arith.constant 0 : index
    %c0_8 = arith.constant 0 : index
    %4 = vector.load %arg6[%c0_7, %c0_8] : memref<1x64xf32, #tpu.memory_space<vmem>>, vector<1x64xf32>
    %c0_9 = arith.constant 0 : index
    %c0_10 = arith.constant 0 : index
    %5 = vector.load %arg7[%c0_9, %c0_10] : memref<64x32xf32, #tpu.memory_space<vmem>>, vector<64x32xf32>
    %c0_11 = arith.constant 0 : index
    %c0_12 = arith.constant 0 : index
    %6 = vector.load %arg8[%c0_11, %c0_12] : memref<6x32xf32, #tpu.memory_space<vmem>>, vector<6x32xf32>
    %7 = vector.extract_strided_slice %6 {offsets = [0, 0], sizes = [1, 32], strides = [1, 1]} : vector<6x32xf32> to vector<1x32xf32>
    %8 = vector.extract_strided_slice %6 {offsets = [1, 0], sizes = [1, 32], strides = [1, 1]} : vector<6x32xf32> to vector<1x32xf32>
    %9 = vector.extract_strided_slice %6 {offsets = [2, 0], sizes = [1, 32], strides = [1, 1]} : vector<6x32xf32> to vector<1x32xf32>
    %10 = vector.extract_strided_slice %6 {offsets = [3, 0], sizes = [1, 32], strides = [1, 1]} : vector<6x32xf32> to vector<1x32xf32>
    %11 = vector.extract_strided_slice %6 {offsets = [4, 0], sizes = [1, 32], strides = [1, 1]} : vector<6x32xf32> to vector<1x32xf32>
    %12 = vector.extract_strided_slice %6 {offsets = [5, 0], sizes = [1, 32], strides = [1, 1]} : vector<6x32xf32> to vector<1x32xf32>
    %c0_13 = arith.constant 0 : index
    %c0_14 = arith.constant 0 : index
    %13 = vector.load %arg1[%c0_13, %c0_14] : memref<8x32xf32, #tpu.memory_space<vmem>>, vector<8x32xf32>
    %cst = arith.constant dense<0.000000e+00> : vector<8x96xf32>
    %14 = tpu.matmul %13, %0, %cst {dimension_numbers = #tpu.dot_dimension_numbers<[1], [0], [0], [1], [0, 0, 1, 1], [], []>} : vector<8x32xf32>, vector<32x96xf32>, vector<8x96xf32> -> vector<8x96xf32>
    %15 = vector.broadcast %1 : vector<1x96xf32> to vector<8x96xf32>
    %16 = arith.addf %14, %15 : vector<8x96xf32>
    %17 = vector.extract_strided_slice %16 {offsets = [0, 0], sizes = [8, 8], strides = [1, 1]} : vector<8x96xf32> to vector<8x8xf32>
    %18 = vector.extract_strided_slice %16 {offsets = [0, 8], sizes = [8, 8], strides = [1, 1]} : vector<8x96xf32> to vector<8x8xf32>
    %19 = vector.extract_strided_slice %16 {offsets = [0, 16], sizes = [8, 8], strides = [1, 1]} : vector<8x96xf32> to vector<8x8xf32>
    %20 = vector.extract_strided_slice %16 {offsets = [0, 24], sizes = [8, 8], strides = [1, 1]} : vector<8x96xf32> to vector<8x8xf32>
    %21 = vector.extract_strided_slice %16 {offsets = [0, 32], sizes = [8, 8], strides = [1, 1]} : vector<8x96xf32> to vector<8x8xf32>
    %22 = vector.extract_strided_slice %16 {offsets = [0, 40], sizes = [8, 8], strides = [1, 1]} : vector<8x96xf32> to vector<8x8xf32>
    %23 = vector.extract_strided_slice %16 {offsets = [0, 48], sizes = [8, 8], strides = [1, 1]} : vector<8x96xf32> to vector<8x8xf32>
    %24 = vector.extract_strided_slice %16 {offsets = [0, 56], sizes = [8, 8], strides = [1, 1]} : vector<8x96xf32> to vector<8x8xf32>
    %25 = vector.extract_strided_slice %16 {offsets = [0, 64], sizes = [8, 8], strides = [1, 1]} : vector<8x96xf32> to vector<8x8xf32>
    %26 = vector.extract_strided_slice %16 {offsets = [0, 72], sizes = [8, 8], strides = [1, 1]} : vector<8x96xf32> to vector<8x8xf32>
    %27 = vector.extract_strided_slice %16 {offsets = [0, 80], sizes = [8, 8], strides = [1, 1]} : vector<8x96xf32> to vector<8x8xf32>
    %28 = vector.extract_strided_slice %16 {offsets = [0, 88], sizes = [8, 8], strides = [1, 1]} : vector<8x96xf32> to vector<8x8xf32>
    %29 = vector.shape_cast %17 : vector<8x8xf32> to vector<1x8x8xf32>
    %30 = vector.shape_cast %18 : vector<8x8xf32> to vector<1x8x8xf32>
    %31 = vector.shape_cast %19 : vector<8x8xf32> to vector<1x8x8xf32>
    %32 = vector.shape_cast %20 : vector<8x8xf32> to vector<1x8x8xf32>
    %33 = vector.shape_cast %21 : vector<8x8xf32> to vector<1x8x8xf32>
    %34 = vector.shape_cast %22 : vector<8x8xf32> to vector<1x8x8xf32>
    %35 = vector.shape_cast %23 : vector<8x8xf32> to vector<1x8x8xf32>
    %36 = vector.shape_cast %24 : vector<8x8xf32> to vector<1x8x8xf32>
    %37 = vector.shape_cast %25 : vector<8x8xf32> to vector<1x8x8xf32>
    %38 = vector.shape_cast %26 : vector<8x8xf32> to vector<1x8x8xf32>
    %39 = vector.shape_cast %27 : vector<8x8xf32> to vector<1x8x8xf32>
    %40 = vector.shape_cast %28 : vector<8x8xf32> to vector<1x8x8xf32>
    %41 = tpu.concatenate %29, %30, %31, %32, %33, %34, %35, %36, %37, %38, %39, %40 in 0 : vector<1x8x8xf32>, vector<1x8x8xf32>, vector<1x8x8xf32>, vector<1x8x8xf32>, vector<1x8x8xf32>, vector<1x8x8xf32>, vector<1x8x8xf32>, vector<1x8x8xf32>, vector<1x8x8xf32>, vector<1x8x8xf32>, vector<1x8x8xf32>, vector<1x8x8xf32> -> vector<12x8x8xf32>
    %42 = vector.extract_strided_slice %41 {offsets = [0, 0, 0], sizes = [4, 8, 8], strides = [1, 1, 1]} : vector<12x8x8xf32> to vector<4x8x8xf32>
    %43 = vector.extract_strided_slice %41 {offsets = [4, 0, 0], sizes = [4, 8, 8], strides = [1, 1, 1]} : vector<12x8x8xf32> to vector<4x8x8xf32>
    %44 = vector.extract_strided_slice %41 {offsets = [8, 0, 0], sizes = [4, 8, 8], strides = [1, 1, 1]} : vector<12x8x8xf32> to vector<4x8x8xf32>
    "tpu.trace_start"() <{level = 10 : i32, message = "hqd,hkd->hqk"}> : () -> ()
    %cst_15 = arith.constant dense<0.000000e+00> : vector<4x8x8xf32>
    %45 = tpu.matmul %42, %43, %cst_15 {dimension_numbers = #tpu.dot_dimension_numbers<[2], [2], [1], [1], [0, 0, 0, 1, 1, 1], [0], [0]>} : vector<4x8x8xf32>, vector<4x8x8xf32>, vector<4x8x8xf32> -> vector<4x8x8xf32>
    "tpu.trace_stop"() : () -> ()
    %cst_16 = arith.constant 0.353553385 : f32
    %46 = vector.broadcast %cst_16 : f32 to vector<4x8x8xf32>
    %47 = arith.mulf %45, %46 : vector<4x8x8xf32>
    %cst_17 = arith.constant dense<0xFF800000> : vector<4x8xf32>
    %48 = vector.multi_reduction <maximumf>, %47, %cst_17 [2] : vector<4x8x8xf32> to vector<4x8xf32>
    %49 = vector.shape_cast %48 : vector<4x8xf32> to vector<4x8x1xf32>
    %50 = vector.broadcast %49 : vector<4x8x1xf32> to vector<4x8x8xf32>
    %51 = arith.subf %47, %50 : vector<4x8x8xf32>
    %52 = math.exp %51 : vector<4x8x8xf32>
    %cst_18 = arith.constant dense<0.000000e+00> : vector<4x8xf32>
    %53 = vector.multi_reduction <add>, %52, %cst_18 [2] : vector<4x8x8xf32> to vector<4x8xf32>
    %54 = vector.shape_cast %53 : vector<4x8xf32> to vector<4x8x1xf32>
    %55 = tpu.reciprocal %54 {approx = true} : vector<4x8x1xf32> -> vector<4x8x1xf32>
    %56 = vector.broadcast %55 : vector<4x8x1xf32> to vector<4x8x8xf32>
    %57 = arith.mulf %52, %56 : vector<4x8x8xf32>
    "tpu.trace_start"() <{level = 10 : i32, message = "hqk,hkd->hqd"}> : () -> ()
    %cst_19 = arith.constant dense<0.000000e+00> : vector<4x8x8xf32>
    %58 = tpu.matmul %57, %44, %cst_19 {dimension_numbers = #tpu.dot_dimension_numbers<[2], [1], [1], [2], [0, 0, 0, 1, 1, 2], [0], [0]>} : vector<4x8x8xf32>, vector<4x8x8xf32>, vector<4x8x8xf32> -> vector<4x8x8xf32>
    "tpu.trace_stop"() : () -> ()
    %59 = vector.extract_strided_slice %58 {offsets = [0, 0, 0], sizes = [1, 8, 8], strides = [1, 1, 1]} : vector<4x8x8xf32> to vector<1x8x8xf32>
    %60 = vector.shape_cast %59 : vector<1x8x8xf32> to vector<8x8xf32>
    %61 = vector.extract_strided_slice %58 {offsets = [1, 0, 0], sizes = [1, 8, 8], strides = [1, 1, 1]} : vector<4x8x8xf32> to vector<1x8x8xf32>
    %62 = vector.shape_cast %61 : vector<1x8x8xf32> to vector<8x8xf32>
    %63 = vector.extract_strided_slice %58 {offsets = [2, 0, 0], sizes = [1, 8, 8], strides = [1, 1, 1]} : vector<4x8x8xf32> to vector<1x8x8xf32>
    %64 = vector.shape_cast %63 : vector<1x8x8xf32> to vector<8x8xf32>
    %65 = vector.extract_strided_slice %58 {offsets = [3, 0, 0], sizes = [1, 8, 8], strides = [1, 1, 1]} : vector<4x8x8xf32> to vector<1x8x8xf32>
    %66 = vector.shape_cast %65 : vector<1x8x8xf32> to vector<8x8xf32>
    %67 = tpu.concatenate %60, %62, %64, %66 in 1 : vector<8x8xf32>, vector<8x8xf32>, vector<8x8xf32>, vector<8x8xf32> -> vector<8x32xf32>
    %cst_20 = arith.constant dense<0.000000e+00> : vector<8x32xf32>
    %68 = tpu.matmul %67, %2, %cst_20 {dimension_numbers = #tpu.dot_dimension_numbers<[1], [0], [0], [1], [0, 0, 1, 1], [], []>} : vector<8x32xf32>, vector<32x32xf32>, vector<8x32xf32> -> vector<8x32xf32>
    %69 = vector.broadcast %7 : vector<1x32xf32> to vector<8x32xf32>
    %70 = arith.addf %68, %69 : vector<8x32xf32>
    %71 = arith.addf %13, %70 : vector<8x32xf32>
    %cst_21 = arith.constant dense<0.000000e+00> : vector<8xf32>
    %72 = vector.multi_reduction <add>, %71, %cst_21 [1] : vector<8x32xf32> to vector<8xf32>
    %73 = vector.shape_cast %72 : vector<8xf32> to vector<8x1xf32>
    %cst_22 = arith.constant 3.200000e+01 : f32
    %74 = vector.broadcast %cst_22 : f32 to vector<8x1xf32>
    %75 = arith.divf %73, %74 : vector<8x1xf32>
    %76 = vector.broadcast %75 : vector<8x1xf32> to vector<8x32xf32>
    %77 = arith.subf %71, %76 : vector<8x32xf32>
    %78 = arith.mulf %77, %77 : vector<8x32xf32>
    %cst_23 = arith.constant dense<0.000000e+00> : vector<8xf32>
    %79 = vector.multi_reduction <add>, %78, %cst_23 [1] : vector<8x32xf32> to vector<8xf32>
    %80 = vector.shape_cast %79 : vector<8xf32> to vector<8x1xf32>
    %cst_24 = arith.constant 3.200000e+01 : f32
    %81 = vector.broadcast %cst_24 : f32 to vector<8x1xf32>
    %82 = arith.divf %80, %81 : vector<8x1xf32>
    %83 = vector.broadcast %75 : vector<8x1xf32> to vector<8x32xf32>
    %84 = arith.subf %71, %83 : vector<8x32xf32>
    %cst_25 = arith.constant 9.99999974E-6 : f32
    %85 = vector.broadcast %cst_25 : f32 to vector<8x1xf32>
    %86 = arith.addf %82, %85 : vector<8x1xf32>
    %87 = math.rsqrt %86 : vector<8x1xf32>
    %88 = vector.broadcast %87 : vector<8x1xf32> to vector<8x32xf32>
    %89 = arith.mulf %84, %88 : vector<8x32xf32>
    %90 = vector.broadcast %9 : vector<1x32xf32> to vector<8x32xf32>
    %91 = arith.mulf %89, %90 : vector<8x32xf32>
    %92 = vector.broadcast %10 : vector<1x32xf32> to vector<8x32xf32>
    %93 = arith.addf %91, %92 : vector<8x32xf32>
    %cst_26 = arith.constant dense<0.000000e+00> : vector<8x64xf32>
    %94 = tpu.matmul %93, %3, %cst_26 {dimension_numbers = #tpu.dot_dimension_numbers<[1], [0], [0], [1], [0, 0, 1, 1], [], []>} : vector<8x32xf32>, vector<32x64xf32>, vector<8x64xf32> -> vector<8x64xf32>
    %95 = vector.broadcast %4 : vector<1x64xf32> to vector<8x64xf32>
    %96 = arith.addf %94, %95 : vector<8x64xf32>
    %cst_27 = arith.constant 0.000000e+00 : f32
    %97 = vector.broadcast %cst_27 : f32 to vector<8x64xf32>
    %98 = arith.maximumf %96, %97 : vector<8x64xf32>
    %cst_28 = arith.constant dense<0.000000e+00> : vector<8x32xf32>
    %99 = tpu.matmul %98, %5, %cst_28 {dimension_numbers = #tpu.dot_dimension_numbers<[1], [0], [0], [1], [0, 0, 1, 1], [], []>} : vector<8x64xf32>, vector<64x32xf32>, vector<8x32xf32> -> vector<8x32xf32>
    %100 = vector.broadcast %8 : vector<1x32xf32> to vector<8x32xf32>
    %101 = arith.addf %99, %100 : vector<8x32xf32>
    %102 = arith.addf %93, %101 : vector<8x32xf32>
    %cst_29 = arith.constant dense<0.000000e+00> : vector<8xf32>
    %103 = vector.multi_reduction <add>, %102, %cst_29 [1] : vector<8x32xf32> to vector<8xf32>
    %104 = vector.shape_cast %103 : vector<8xf32> to vector<8x1xf32>
    %cst_30 = arith.constant 3.200000e+01 : f32
    %105 = vector.broadcast %cst_30 : f32 to vector<8x1xf32>
    %106 = arith.divf %104, %105 : vector<8x1xf32>
    %107 = vector.broadcast %106 : vector<8x1xf32> to vector<8x32xf32>
    %108 = arith.subf %102, %107 : vector<8x32xf32>
    %109 = arith.mulf %108, %108 : vector<8x32xf32>
    %cst_31 = arith.constant dense<0.000000e+00> : vector<8xf32>
    %110 = vector.multi_reduction <add>, %109, %cst_31 [1] : vector<8x32xf32> to vector<8xf32>
    %111 = vector.shape_cast %110 : vector<8xf32> to vector<8x1xf32>
    %cst_32 = arith.constant 3.200000e+01 : f32
    %112 = vector.broadcast %cst_32 : f32 to vector<8x1xf32>
    %113 = arith.divf %111, %112 : vector<8x1xf32>
    %114 = vector.broadcast %106 : vector<8x1xf32> to vector<8x32xf32>
    %115 = arith.subf %102, %114 : vector<8x32xf32>
    %cst_33 = arith.constant 9.99999974E-6 : f32
    %116 = vector.broadcast %cst_33 : f32 to vector<8x1xf32>
    %117 = arith.addf %113, %116 : vector<8x1xf32>
    %118 = math.rsqrt %117 : vector<8x1xf32>
    %119 = vector.broadcast %118 : vector<8x1xf32> to vector<8x32xf32>
    %120 = arith.mulf %115, %119 : vector<8x32xf32>
    %121 = vector.broadcast %11 : vector<1x32xf32> to vector<8x32xf32>
    %122 = arith.mulf %120, %121 : vector<8x32xf32>
    %123 = vector.broadcast %12 : vector<1x32xf32> to vector<8x32xf32>
    %124 = arith.addf %122, %123 : vector<8x32xf32>
    %cst_34 = arith.constant dense<0.000000e+00> : vector<8x96xf32>
    %125 = tpu.matmul %124, %0, %cst_34 {dimension_numbers = #tpu.dot_dimension_numbers<[1], [0], [0], [1], [0, 0, 1, 1], [], []>} : vector<8x32xf32>, vector<32x96xf32>, vector<8x96xf32> -> vector<8x96xf32>
    %126 = vector.broadcast %1 : vector<1x96xf32> to vector<8x96xf32>
    %127 = arith.addf %125, %126 : vector<8x96xf32>
    %128 = vector.extract_strided_slice %127 {offsets = [0, 0], sizes = [8, 8], strides = [1, 1]} : vector<8x96xf32> to vector<8x8xf32>
    %129 = vector.extract_strided_slice %127 {offsets = [0, 8], sizes = [8, 8], strides = [1, 1]} : vector<8x96xf32> to vector<8x8xf32>
    %130 = vector.extract_strided_slice %127 {offsets = [0, 16], sizes = [8, 8], strides = [1, 1]} : vector<8x96xf32> to vector<8x8xf32>
    %131 = vector.extract_strided_slice %127 {offsets = [0, 24], sizes = [8, 8], strides = [1, 1]} : vector<8x96xf32> to vector<8x8xf32>
    %132 = vector.extract_strided_slice %127 {offsets = [0, 32], sizes = [8, 8], strides = [1, 1]} : vector<8x96xf32> to vector<8x8xf32>
    %133 = vector.extract_strided_slice %127 {offsets = [0, 40], sizes = [8, 8], strides = [1, 1]} : vector<8x96xf32> to vector<8x8xf32>
    %134 = vector.extract_strided_slice %127 {offsets = [0, 48], sizes = [8, 8], strides = [1, 1]} : vector<8x96xf32> to vector<8x8xf32>
    %135 = vector.extract_strided_slice %127 {offsets = [0, 56], sizes = [8, 8], strides = [1, 1]} : vector<8x96xf32> to vector<8x8xf32>
    %136 = vector.extract_strided_slice %127 {offsets = [0, 64], sizes = [8, 8], strides = [1, 1]} : vector<8x96xf32> to vector<8x8xf32>
    %137 = vector.extract_strided_slice %127 {offsets = [0, 72], sizes = [8, 8], strides = [1, 1]} : vector<8x96xf32> to vector<8x8xf32>
    %138 = vector.extract_strided_slice %127 {offsets = [0, 80], sizes = [8, 8], strides = [1, 1]} : vector<8x96xf32> to vector<8x8xf32>
    %139 = vector.extract_strided_slice %127 {offsets = [0, 88], sizes = [8, 8], strides = [1, 1]} : vector<8x96xf32> to vector<8x8xf32>
    %140 = vector.shape_cast %128 : vector<8x8xf32> to vector<1x8x8xf32>
    %141 = vector.shape_cast %129 : vector<8x8xf32> to vector<1x8x8xf32>
    %142 = vector.shape_cast %130 : vector<8x8xf32> to vector<1x8x8xf32>
    %143 = vector.shape_cast %131 : vector<8x8xf32> to vector<1x8x8xf32>
    %144 = vector.shape_cast %132 : vector<8x8xf32> to vector<1x8x8xf32>
    %145 = vector.shape_cast %133 : vector<8x8xf32> to vector<1x8x8xf32>
    %146 = vector.shape_cast %134 : vector<8x8xf32> to vector<1x8x8xf32>
    %147 = vector.shape_cast %135 : vector<8x8xf32> to vector<1x8x8xf32>
    %148 = vector.shape_cast %136 : vector<8x8xf32> to vector<1x8x8xf32>
    %149 = vector.shape_cast %137 : vector<8x8xf32> to vector<1x8x8xf32>
    %150 = vector.shape_cast %138 : vector<8x8xf32> to vector<1x8x8xf32>
    %151 = vector.shape_cast %139 : vector<8x8xf32> to vector<1x8x8xf32>
    %152 = tpu.concatenate %140, %141, %142, %143, %144, %145, %146, %147, %148, %149, %150, %151 in 0 : vector<1x8x8xf32>, vector<1x8x8xf32>, vector<1x8x8xf32>, vector<1x8x8xf32>, vector<1x8x8xf32>, vector<1x8x8xf32>, vector<1x8x8xf32>, vector<1x8x8xf32>, vector<1x8x8xf32>, vector<1x8x8xf32>, vector<1x8x8xf32>, vector<1x8x8xf32> -> vector<12x8x8xf32>
    %153 = vector.extract_strided_slice %152 {offsets = [0, 0, 0], sizes = [4, 8, 8], strides = [1, 1, 1]} : vector<12x8x8xf32> to vector<4x8x8xf32>
    %154 = vector.extract_strided_slice %152 {offsets = [4, 0, 0], sizes = [4, 8, 8], strides = [1, 1, 1]} : vector<12x8x8xf32> to vector<4x8x8xf32>
    %155 = vector.extract_strided_slice %152 {offsets = [8, 0, 0], sizes = [4, 8, 8], strides = [1, 1, 1]} : vector<12x8x8xf32> to vector<4x8x8xf32>
    "tpu.trace_start"() <{level = 10 : i32, message = "hqd,hkd->hqk"}> : () -> ()
    %cst_35 = arith.constant dense<0.000000e+00> : vector<4x8x8xf32>
    %156 = tpu.matmul %153, %154, %cst_35 {dimension_numbers = #tpu.dot_dimension_numbers<[2], [2], [1], [1], [0, 0, 0, 1, 1, 1], [0], [0]>} : vector<4x8x8xf32>, vector<4x8x8xf32>, vector<4x8x8xf32> -> vector<4x8x8xf32>
    "tpu.trace_stop"() : () -> ()
    %cst_36 = arith.constant 0.353553385 : f32
    %157 = vector.broadcast %cst_36 : f32 to vector<4x8x8xf32>
    %158 = arith.mulf %156, %157 : vector<4x8x8xf32>
    %cst_37 = arith.constant dense<0xFF800000> : vector<4x8xf32>
    %159 = vector.multi_reduction <maximumf>, %158, %cst_37 [2] : vector<4x8x8xf32> to vector<4x8xf32>
    %160 = vector.shape_cast %159 : vector<4x8xf32> to vector<4x8x1xf32>
    %161 = vector.broadcast %160 : vector<4x8x1xf32> to vector<4x8x8xf32>
    %162 = arith.subf %158, %161 : vector<4x8x8xf32>
    %163 = math.exp %162 : vector<4x8x8xf32>
    %cst_38 = arith.constant dense<0.000000e+00> : vector<4x8xf32>
    %164 = vector.multi_reduction <add>, %163, %cst_38 [2] : vector<4x8x8xf32> to vector<4x8xf32>
    %165 = vector.shape_cast %164 : vector<4x8xf32> to vector<4x8x1xf32>
    %166 = tpu.reciprocal %165 {approx = true} : vector<4x8x1xf32> -> vector<4x8x1xf32>
    %167 = vector.broadcast %166 : vector<4x8x1xf32> to vector<4x8x8xf32>
    %168 = arith.mulf %163, %167 : vector<4x8x8xf32>
    "tpu.trace_start"() <{level = 10 : i32, message = "hqk,hkd->hqd"}> : () -> ()
    %cst_39 = arith.constant dense<0.000000e+00> : vector<4x8x8xf32>
    %169 = tpu.matmul %168, %155, %cst_39 {dimension_numbers = #tpu.dot_dimension_numbers<[2], [1], [1], [2], [0, 0, 0, 1, 1, 2], [0], [0]>} : vector<4x8x8xf32>, vector<4x8x8xf32>, vector<4x8x8xf32> -> vector<4x8x8xf32>
    "tpu.trace_stop"() : () -> ()
    %170 = vector.extract_strided_slice %169 {offsets = [0, 0, 0], sizes = [1, 8, 8], strides = [1, 1, 1]} : vector<4x8x8xf32> to vector<1x8x8xf32>
    %171 = vector.shape_cast %170 : vector<1x8x8xf32> to vector<8x8xf32>
    %172 = vector.extract_strided_slice %169 {offsets = [1, 0, 0], sizes = [1, 8, 8], strides = [1, 1, 1]} : vector<4x8x8xf32> to vector<1x8x8xf32>
    %173 = vector.shape_cast %172 : vector<1x8x8xf32> to vector<8x8xf32>
    %174 = vector.extract_strided_slice %169 {offsets = [2, 0, 0], sizes = [1, 8, 8], strides = [1, 1, 1]} : vector<4x8x8xf32> to vector<1x8x8xf32>
    %175 = vector.shape_cast %174 : vector<1x8x8xf32> to vector<8x8xf32>
    %176 = vector.extract_strided_slice %169 {offsets = [3, 0, 0], sizes = [1, 8, 8], strides = [1, 1, 1]} : vector<4x8x8xf32> to vector<1x8x8xf32>
    %177 = vector.shape_cast %176 : vector<1x8x8xf32> to vector<8x8xf32>
    %178 = tpu.concatenate %171, %173, %175, %177 in 1 : vector<8x8xf32>, vector<8x8xf32>, vector<8x8xf32>, vector<8x8xf32> -> vector<8x32xf32>
    %cst_40 = arith.constant dense<0.000000e+00> : vector<8x32xf32>
    %179 = tpu.matmul %178, %2, %cst_40 {dimension_numbers = #tpu.dot_dimension_numbers<[1], [0], [0], [1], [0, 0, 1, 1], [], []>} : vector<8x32xf32>, vector<32x32xf32>, vector<8x32xf32> -> vector<8x32xf32>
    %180 = vector.broadcast %7 : vector<1x32xf32> to vector<8x32xf32>
    %181 = arith.addf %179, %180 : vector<8x32xf32>
    %182 = arith.addf %124, %181 : vector<8x32xf32>
    %cst_41 = arith.constant dense<0.000000e+00> : vector<8xf32>
    %183 = vector.multi_reduction <add>, %182, %cst_41 [1] : vector<8x32xf32> to vector<8xf32>
    %184 = vector.shape_cast %183 : vector<8xf32> to vector<8x1xf32>
    %cst_42 = arith.constant 3.200000e+01 : f32
    %185 = vector.broadcast %cst_42 : f32 to vector<8x1xf32>
    %186 = arith.divf %184, %185 : vector<8x1xf32>
    %187 = vector.broadcast %186 : vector<8x1xf32> to vector<8x32xf32>
    %188 = arith.subf %182, %187 : vector<8x32xf32>
    %189 = arith.mulf %188, %188 : vector<8x32xf32>
    %cst_43 = arith.constant dense<0.000000e+00> : vector<8xf32>
    %190 = vector.multi_reduction <add>, %189, %cst_43 [1] : vector<8x32xf32> to vector<8xf32>
    %191 = vector.shape_cast %190 : vector<8xf32> to vector<8x1xf32>
    %cst_44 = arith.constant 3.200000e+01 : f32
    %192 = vector.broadcast %cst_44 : f32 to vector<8x1xf32>
    %193 = arith.divf %191, %192 : vector<8x1xf32>
    %194 = vector.broadcast %186 : vector<8x1xf32> to vector<8x32xf32>
    %195 = arith.subf %182, %194 : vector<8x32xf32>
    %cst_45 = arith.constant 9.99999974E-6 : f32
    %196 = vector.broadcast %cst_45 : f32 to vector<8x1xf32>
    %197 = arith.addf %193, %196 : vector<8x1xf32>
    %198 = math.rsqrt %197 : vector<8x1xf32>
    %199 = vector.broadcast %198 : vector<8x1xf32> to vector<8x32xf32>
    %200 = arith.mulf %195, %199 : vector<8x32xf32>
    %201 = vector.broadcast %9 : vector<1x32xf32> to vector<8x32xf32>
    %202 = arith.mulf %200, %201 : vector<8x32xf32>
    %203 = vector.broadcast %10 : vector<1x32xf32> to vector<8x32xf32>
    %204 = arith.addf %202, %203 : vector<8x32xf32>
    %cst_46 = arith.constant dense<0.000000e+00> : vector<8x64xf32>
    %205 = tpu.matmul %204, %3, %cst_46 {dimension_numbers = #tpu.dot_dimension_numbers<[1], [0], [0], [1], [0, 0, 1, 1], [], []>} : vector<8x32xf32>, vector<32x64xf32>, vector<8x64xf32> -> vector<8x64xf32>
    %206 = vector.broadcast %4 : vector<1x64xf32> to vector<8x64xf32>
    %207 = arith.addf %205, %206 : vector<8x64xf32>
    %cst_47 = arith.constant 0.000000e+00 : f32
    %208 = vector.broadcast %cst_47 : f32 to vector<8x64xf32>
    %209 = arith.maximumf %207, %208 : vector<8x64xf32>
    %cst_48 = arith.constant dense<0.000000e+00> : vector<8x32xf32>
    %210 = tpu.matmul %209, %5, %cst_48 {dimension_numbers = #tpu.dot_dimension_numbers<[1], [0], [0], [1], [0, 0, 1, 1], [], []>} : vector<8x64xf32>, vector<64x32xf32>, vector<8x32xf32> -> vector<8x32xf32>
    %211 = vector.broadcast %8 : vector<1x32xf32> to vector<8x32xf32>
    %212 = arith.addf %210, %211 : vector<8x32xf32>
    %213 = arith.addf %204, %212 : vector<8x32xf32>
    %cst_49 = arith.constant dense<0.000000e+00> : vector<8xf32>
    %214 = vector.multi_reduction <add>, %213, %cst_49 [1] : vector<8x32xf32> to vector<8xf32>
    %215 = vector.shape_cast %214 : vector<8xf32> to vector<8x1xf32>
    %cst_50 = arith.constant 3.200000e+01 : f32
    %216 = vector.broadcast %cst_50 : f32 to vector<8x1xf32>
    %217 = arith.divf %215, %216 : vector<8x1xf32>
    %218 = vector.broadcast %217 : vector<8x1xf32> to vector<8x32xf32>
    %219 = arith.subf %213, %218 : vector<8x32xf32>
    %220 = arith.mulf %219, %219 : vector<8x32xf32>
    %cst_51 = arith.constant dense<0.000000e+00> : vector<8xf32>
    %221 = vector.multi_reduction <add>, %220, %cst_51 [1] : vector<8x32xf32> to vector<8xf32>
    %222 = vector.shape_cast %221 : vector<8xf32> to vector<8x1xf32>
    %cst_52 = arith.constant 3.200000e+01 : f32
    %223 = vector.broadcast %cst_52 : f32 to vector<8x1xf32>
    %224 = arith.divf %222, %223 : vector<8x1xf32>
    %225 = vector.broadcast %217 : vector<8x1xf32> to vector<8x32xf32>
    %226 = arith.subf %213, %225 : vector<8x32xf32>
    %cst_53 = arith.constant 9.99999974E-6 : f32
    %227 = vector.broadcast %cst_53 : f32 to vector<8x1xf32>
    %228 = arith.addf %224, %227 : vector<8x1xf32>
    %229 = math.rsqrt %228 : vector<8x1xf32>
    %230 = vector.broadcast %229 : vector<8x1xf32> to vector<8x32xf32>
    %231 = arith.mulf %226, %230 : vector<8x32xf32>
    %232 = vector.broadcast %11 : vector<1x32xf32> to vector<8x32xf32>
    %233 = arith.mulf %231, %232 : vector<8x32xf32>
    %234 = vector.broadcast %12 : vector<1x32xf32> to vector<8x32xf32>
    %235 = arith.addf %233, %234 : vector<8x32xf32>
    %c0_54 = arith.constant 0 : index
    %c0_55 = arith.constant 0 : index
    %236 = vector.load %arg9[%c0_54, %c0_55] : memref<8x32xf32, #tpu.memory_space<vmem>>, vector<8x32xf32>
    tpu.vector_store %arg9[%c0_54, %c0_55], %235 {strides = array<i32>} : memref<8x32xf32, #tpu.memory_space<vmem>>, vector<8x32xf32>,
    return
  }
  func.func @transform_0(%arg0: i32) -> (i32, i32) {
    %c0_i32 = arith.constant 0 : i32
    %c0_i32_0 = arith.constant 0 : i32
    return %arg0, %c0_i32 : i32, i32
  }
  func.func @transform_1(%arg0: i32) -> (i32, i32) {
    %c0_i32 = arith.constant 0 : i32
    %c0_i32_0 = arith.constant 0 : i32
    %c0_i32_1 = arith.constant 0 : i32
    return %c0_i32, %c0_i32_0 : i32, i32
  }
  func.func @transform_2(%arg0: i32) -> (i32, i32) {
    %c0_i32 = arith.constant 0 : i32
    %c0_i32_0 = arith.constant 0 : i32
    %c0_i32_1 = arith.constant 0 : i32
    return %c0_i32, %c0_i32_0 : i32, i32
  }
  func.func @transform_3(%arg0: i32) -> (i32, i32) {
    %c0_i32 = arith.constant 0 : i32
    %c0_i32_0 = arith.constant 0 : i32
    %c0_i32_1 = arith.constant 0 : i32
    return %c0_i32, %c0_i32_0 : i32, i32
  }
  func.func @transform_4(%arg0: i32) -> (i32, i32) {
    %c0_i32 = arith.constant 0 : i32
    %c0_i32_0 = arith.constant 0 : i32
    %c0_i32_1 = arith.constant 0 : i32
    return %c0_i32, %c0_i32_0 : i32, i32
  }
  func.func @transform_5(%arg0: i32) -> (i32, i32) {
    %c0_i32 = arith.constant 0 : i32
    %c0_i32_0 = arith.constant 0 : i32
    %c0_i32_1 = arith.constant 0 : i32
    return %c0_i32, %c0_i32_0 : i32, i32
  }
  func.func @transform_6(%arg0: i32) -> (i32, i32) {
    %c0_i32 = arith.constant 0 : i32
    %c0_i32_0 = arith.constant 0 : i32
    %c0_i32_1 = arith.constant 0 : i32
    return %c0_i32, %c0_i32_0 : i32, i32
  }
  func.func @transform_7(%arg0: i32) -> (i32, i32) {
    %c0_i32 = arith.constant 0 : i32
    %c0_i32_0 = arith.constant 0 : i32
    %c0_i32_1 = arith.constant 0 : i32
    return %c0_i32, %c0_i32_0 : i32, i32
  }
  func.func @transform_8(%arg0: i32) -> (i32, i32) {
    %c0_i32 = arith.constant 0 : i32
    %c0_i32_0 = arith.constant 0 : i32
    return %arg0, %c0_i32 : i32, i32
  }
}

</mosaic_0001>

<bundles_post_ra>
// kernel: tpu_custom_call.1
= control target key start
LH: loop header
LB: loop body
LE: loop exit
PB: predicated region body
PF: predicated region fallthrough
CT: control target
= control target key end

     0   :  { %13 = vsyncpa [#allocation3], 0  ;;  %s3646_s0 = inlined_call_operand.hbm [shape: f32[16,32], index: 0, kind: input, shape index: {}]   ;;  %s3647_s1 = inlined_call_operand.vmem [shape: f32[32,96], index: 1, kind: input, shape index: {}]   ;;  %s3648_s2 = inlined_call_operand.vmem [shape: f32[1,96], index: 2, kind: input, shape index: {}]   ;;  %s3649_s3 = inlined_call_operand.vmem [shape: f32[32,32], index: 3, kind: input, shape index: {}]   ;;  %s3650_s4 = inlined_call_operand.vmem [shape: f32[32,64], index: 4, kind: input, shape index: {}]   ;;  %s3651_s5 = inlined_call_operand.vmem [shape: f32[1,64], index: 5, kind: input, shape index: {}]   ;;  %s3652_s6 = inlined_call_operand.vmem [shape: f32[64,32], index: 6, kind: input, shape index: {}]   ;;  %s3653_s7 = inlined_call_operand.vmem [shape: f32[6,32], index: 7, kind: input, shape index: {}]   ;;  %s3654_s8 = inlined_call_operand.hbm [shape: f32[16,32], index: 8, kind: output, shape index: {}]  }
   0x1   :  { %15 = vsyncpa [#allocation3 + $0x1], 0 }
   0x2   :  { %16 = vsyncpa [#allocation4], 0 }
   0x3   :  { %18 = vsyncpa [#allocation4 + $0x1], 0  ;;  %s3113_s27 = smov 0   ;;  %s3115_s28 = smov 0  }
   0x4   :  { %s3117_s29 = smov 0   ;;  %s3119_s30 = smov 0  }
   0x5 LB: > { %s3134_s9 = sadd.s32 4294967295, %s3047_s30   ;;  %s2478_s10 = sadd.s32 4294967294, %s3047_s30   ;;  %s3047_s30 = sphi %s3119_s30, %s3691_s30   ;;  %s3043_s29 = sphi %s3117_s29, %s3690_s29   ;;  %s3039_s28 = sphi %s3115_s28, %s3689_s28   ;;  %s3035_s27 = sphi %s3113_s27, %s3688_s27  }
   0x6   : > { %s3138_s11 = sadd.s32 1, %s3047_s30   ;;  %s31_s12 = sadd.s32 1, %s3043_s29 }
   0x7   : > { %s28_s13 = ssub.s32 %s3047_s30, %s3138_s11  ;;  %p38_p0 = scmp.ne.s32.totalorder %s3043_s29, %s3039_s28 }
   0x8   : > { %p29_p1 = scmp.eq.s32.totalorder %s28_s13, 0  ;;  %p39_p2 = scmp.eq.s32.totalorder %s3047_s30, 0 }
   0x9   : > { %p44_p3 = scmp.ne.s32.totalorder %s3039_s28, %s3035_s27  ;;  %p45_p4 = scmp.eq.s32.totalorder %s3134_s9, 0 }
   0xa   : > { %s3150_s14 = scalar_select %p29_p1, %s3043_s29, %s31_s12  }
   0xb   : > { %p3152_p5 = por %p39_p2, %p38_p0  ;;  %p3156_p6 = por %p45_p4, %p44_p3 }
   0xc   : > { %p215_p7 = scmp.eq.s32.totalorder %s3134_s9, 1  ;;  %p221_p8 = scmp.eq.s32.totalorder %s2478_s10, 1 }
   0xd   : > { %p2860_p10 = scmp.lt.s32.totalorder %s3047_s30, 2  ;;  %s262_s19 = sand.u32 1, %s3043_s29  }
   0xe   : > { %p3163_p11 = por %p215_p7, %p38_p0  ;;  %p3167_p12 = por %p221_p8, %p44_p3 }
   0xf   : > { %s2482_s20 = sshll.u32 %s3047_s30, 7  ;;  %s2481_s21 = sshll.u32 %s262_s19, 3 }
  0x10   : > { %s3669_s17 = scalar_select %p3163_p11, 1, 0 }
  0x11   : > { %s3670_s18 = scalar_select %p3167_p12, 1, 0 }
  0x12   : > { %s3176_s24 = scalar_lea.hbm %s3646_s0, %s2482_s20  ;;  %s266_s25 = scalar_lea.vmem [#allocation2], %s2481_s21 }
  0x13   : > { %s273_s26 = sshll.u32 %s266_s25, 4  ;;  %p3180_p13 = pnand %p2860_p10, %p3152_p5  ;;  %s3184_s26 = int_to_ptr.vmem [resolvable:$true] %s273_s26 }
  0x14   : > { %s263_s12 = scalar_lea.sflag [#allocation3], %s262_s19  ;;  %s2951_s13 = scalar_lea.hbm %s3176_s24, 128 }
  0x15   : > { %p2952_p2 = scmp.ne.s32.totalorder %s3176_s24, %s2951_s13  ;;  %p2953_p3 = pneg %p3180_p13 }
  0x16   : > { %s2956_s21 = scalar_lea.hbm %s3646_s0, 256  ;;  %p2957_p5 = scmp.lt.u32.totalorder %s3176_s24, %s3646_s0 }
  0x17   : > { %p2954_p4 = pnand %p2953_p3, %p2952_p2  ;;  %p2958_p8 = scmp.lt.u32.totalorder %s2956_s21, %s2951_s13 }
  0x18   : > { %p2960_p9 = scmp.lt.u32.totalorder %s2951_s13, %s3176_s24 }
  0x19   : > { %p2955_p7 = pneg %p2954_p4  ;;  %p2959_p10 = por %p2958_p8, %p2957_p5 }
  0x1b   : > { %p2961_p0 = por %p2960_p9, %p2959_p10 }
  0x1d   : > { %p2962_p1 = pnand %p2961_p0, %p2955_p7 }
  0x1f   : > { %2965 = shalt.err (!%p2962_p1)
}
  0x20   : > { %s2966_s19 = scalar_lea.vmem %s3184_s26, 128  ;;  %s3049_s25 = smov [#allocation2]  }
  0x21   : > { %p2967_p2 = scmp.ne.s32.totalorder %s3184_s26, %s2966_s19  ;;  %s2971_s15 = sshll.u32 %s3049_s25, 4  ;;  %s2972_s15 = int_to_ptr.vmem [resolvable:$false] %s2971_s15 }
  0x22   : > { %s2973_s20 = scalar_lea.vmem %s2972_s15, 256  ;;  %p2974_p11 = scmp.lt.s32.totalorder %s3184_s26, %s2972_s15 }
  0x23   : > { %p2969_p4 = pnand %p2967_p2, %p2953_p3  ;;  %p2975_p5 = scmp.lt.s32.totalorder %s2973_s20, %s2966_s19 }
  0x25   : > { %p2970_p12 = pneg %p2969_p4  ;;  %p2976_p8 = por %p2975_p5, %p2974_p11 }
  0x27   : > { %p2977_p9 = pnand %p2976_p8, %p2970_p12 }
  0x29   : > { %2980 = shalt.err (!%p2977_p9)
}
  0x2a   : > { %2855 = dma.hbm_to_vmem [thread:$0]  (!%p3180_p13), %s3176_s24, 128, %s3184_s26, %s263_s12  }
  0x2b   : > { %p3672_p0 = scmp.lt.s32.totalorder %s3047_s30, 3  ;;  %p3673_p1 = scmp.ge.s32.totalorder %s3047_s30, 1 }
  0x2d   : > { %p279_p3 = pnand %p3673_p1, %p3672_p0 }
  0x2e   : > { %s3218_s13 = sand.u32 (!%p279_p3), 1, %s3039_s28  }
  0x2f   : > { %282 = sbr.rel (%p279_p3) target bundleno = 5022 (0x139e), region = 52  ;;  %s3656_s21 = sshll.u32 (!%p279_p3), %s3218_s13, 3 }
  0x30   : > { %s285_s22 = scalar_lea.sflag (!%p279_p3), [#allocation3], %s3218_s13  ;;  %s288_s10 = scalar_lea.vmem (!%p279_p3), [#allocation2], %s3656_s21 }
  0x36   : > { %3026 = dma.done.wait (%p3156_p6), %s285_s22, 128  }
  0x37   : > { %3028 = vsyncadd (%p3156_p6), %s285_s22, 4294967168  ;;  %v3050_v0 = vmov 0.0|0.0   ;;  %vm3051_vm0 = vmmov 0   ;;  %v3052_v1 = vmov 0.0   ;;  %v321_v2 = vld [vmem:[%s3647_s1] sm:$0xff]  ;;  %v322_v3 = vld [vmem:[%s3647_s1 + $0x8] sm:$0xff] }
  0x38   : > { %2788 = vmatprep.subr.bf16.mxu1 %v3050_v0  ;;  %2612 = vmatprep.mubr.msk.f32.mxu1 %vm3051_vm0, %v3052_v1  ;;  %v323_v4 = vld [vmem:[%s3647_s1 + $0x10] sm:$0xff]  ;;  %v3243_v5 = vpack.c.bf16 %v322_v3, %v321_v2  ;;  %v324_v6 = vld [vmem:[%s3647_s1 + $0x18] sm:$0xff]  ;;  %v3253_v8 = vld [vmem:[%s288_s10] sm:$0xff]  ;;  %vm351_vm1 = vcmask 261120   ;;  %s3053_s10 = smov 120   ;;  %s3054_s24 = smov 96  }
  0x39   : > { %2625 = vmatprep.subr.mxu0 %v3052_v1  ;;  %2627 = vmatprep.mubr.msk.f32.mxu0 %vm3051_vm0, %v3052_v1  ;;  %v3249_v7 = vpack.c.bf16 %v324_v6, %v323_v4  ;;  %v3263_v9 = vld [vmem:[%s3648_s2] ss:$0 sm:$0xff]  ;;  %s3662_s26 = smov 80   ;;  %s3056_s12 = smov 88   ;;  %vm452_vm2 = vcmask 64512   ;;  %vm1102_vm3 = vcmask 130048  }
  0x3a   : > { %2790 = vmatpush3.bf16.msra.mxu1 %v3243_v5  ;;  %s3661_s16 = smov 112   ;;  %s3058_s23 = smov 72   ;;  %vm1104_vm4 = vcmask 195584   ;;  %vm1292_vm5 = vcmask 523264  }
  0x3b   : > { %2791 = vmatprep.subr.bf16.mxu1 %v3050_v0  ;;  %s3663_s19 = smov 104   ;;  %s3660_s25 = smov 56  }
  0x3c   : > { %s3659_s15 = smov 64   ;;  %s3658_s20 = smov 48  }
  0x3d   : > { %s3657_s22 = smov 40   ;;  %s3666_s21 = smov 8  }
  0x3e   : > { %2793 = vmatpush3.bf16.msra.mxu1 %v3249_v7  ;;  %p3685_p11 = scmp.ne.s32.totalorder %s3669_s17, 0 }
  0x3f   : > { %2615 = vmatprep.subr.mxu1 %v3052_v1 }
  0x41   : > { %2613 = vmatmul.mubr.msk.f32.vlgmr.msra.gmra.mrb[0].mxu1 %vm351_vm1, %v3253_v8 }
  0x42   : > { %2617 = vmatprep.mubr.msk.f32.mxu1 %vm3051_vm0, %v3052_v1 }
 0x114   : > { %v421_v10 = vpop.f32.mrb[0].mxu1 }
 0x115   : > { %v3266_v11 = vadd.f32 %v3263_v9, %v421_v10  ;;  %v2614_v12 = vpop.f32.mrb[1].mxu1 }
 0x117   : > { %426 = vrot.lane.b32.xlu1 %v3266_v11, %s3053_s10  ;;  %432 = vrot.lane.b32.xlu0 %v3266_v11, %s3054_s24 }
 0x11b   : > { %436 = vrot.lane.b32.xlu1 %v3266_v11, %s3662_s26  ;;  %434 = vrot.lane.b32.xlu0 %v3266_v11, %s3056_s12  ;;  %s3665_s26 = smov 24  }
 0x11f   : > { %428 = vrot.lane.b32.xlu1 %v3266_v11, %s3661_s16  ;;  %438 = vrot.lane.b32.xlu0 %v3266_v11, %s3058_s23  ;;  %s3664_s16 = smov 16  }
 0x123   : > { %430 = vrot.lane.b32.xlu0 %v3266_v11, %s3663_s19  ;;  %s3675_s19 = smov 80  }
 0x189   : > { %v427_v13 = vpop.permute.xlu1 %426  ;;  %v433_v14 = vpop.permute.xlu0 %432 }
 0x18a   : > { %2616 = vmatpush3.xpose.msk.msra.mxu1 %vm452_vm2, %v433_v14  ;;  %v326_v14 = vld [vmem:[%s3649_s3] sm:$0xff] }
 0x18b   : > { %2620 = vmatprep.subr.mxu1 %v3052_v1 }
 0x18d   : > { %v437_v15 = vpop.permute.xlu1 %436  ;;  %2618 = vmatmul.mubr.msk.f32.vlgmr.msra.gmra.mrb[2].mxu1 %vm452_vm2, %v3266_v11  ;;  %v435_v16 = vpop.permute.xlu0 %434 }
 0x18e   : > { %2621 = vmatpush3.xpose.msk.msra.mxu1 %vm452_vm2, %v435_v16  ;;  %2626 = vmatpush3.xpose.msk.msra.mxu0 %vm452_vm2, %v437_v15  ;;  %v327_v15 = vld [vmem:[%s3649_s3 + $0x8] sm:$0xff] }
 0x18f   : > { %2622 = vmatprep.mubr.msk.f32.mxu1 %vm3051_vm0, %v3052_v1  ;;  %2630 = vmatprep.subr.mxu1 %v3052_v1  ;;  %v3341_v16 = vpack.c.bf16 %v327_v15, %v326_v14 }
 0x190   : > { %2635 = vmatprep.subr.mxu0 %v3052_v1 }
 0x191   : > { %v429_v17 = vpop.permute.xlu1 %428  ;;  %2623 = vmatmul.mubr.msk.f32.vlgmr.msra.gmra.mrb[4].mxu1 %vm452_vm2, %v427_v13  ;;  %v439_v18 = vpop.permute.xlu0 %438 }
 0x192   : > { %2628 = vmatmul.mubr.msk.f32.vlgmr.msra.gmra.mrb[0].mxu0 %vm452_vm2, %v429_v17  ;;  %2631 = vmatpush3.xpose.msk.msra.mxu1 %vm452_vm2, %v439_v18  ;;  %v328_v17 = vld [vmem:[%s3649_s3 + $0x10] sm:$0xff]  ;;  %v329_v18 = vld [vmem:[%s3649_s3 + $0x18] sm:$0xff] }
 0x193   : > { %2632 = vmatprep.mubr.msk.f32.mxu1 %vm3051_vm0, %v3052_v1  ;;  %2640 = vmatprep.subr.mxu1 %v3052_v1 }
 0x194   : > { %2637 = vmatprep.mubr.msk.f32.mxu0 %vm3051_vm0, %v3052_v1 }
 0x195   : > { %v431_v19 = vpop.permute.xlu0 %430 }
 0x196   : > { %2633 = vmatmul.mubr.msk.f32.vlgmr.msra.gmra.mrb[6].mxu1 %vm452_vm2, %v431_v19  ;;  %v3351_v19 = vpack.c.bf16 %v329_v18, %v328_v17  ;;  %v341_v17 = vld [vmem:[%s3652_s6 + $0x30] sm:$0xff]  ;;  %v342_v18 = vld [vmem:[%s3652_s6 + $0x38] sm:$0xff] }
 0x197   : > { %2642 = vmatprep.mubr.msk.f32.mxu1 %vm3051_vm0, %v3052_v1 }
 0x260   : > { %v523_v20 = vpop.f32.mrb[2].mxu1 }
 0x261   : > { %v749_v21 = vmul.f32 0.35355338, %v523_v20  ;;  %v2619_v22 = vpop.f32.mrb[3].mxu1 }
 0x263   : > { %v753_v23 = vsel %vm452_vm2, %v749_v21, -inf }
 0x264   : > { %754 = vmax.xlane.f32.xlu1 %v753_v23  ;;  %v597_v24 = vpop.f32.mrb[4].mxu1 }
 0x265   : > { %v750_v25 = vmul.f32 0.35355338, %v597_v24  ;;  %v2624_v26 = vpop.f32.mrb[5].mxu1  ;;  %v671_v27 = vpop.f32.mrb[0].mxu0 }
 0x266   : > { %v2629_v28 = vpop.f32.mrb[1].mxu0  ;;  %v751_v29 = vmul.f32 0.35355338, %v671_v27 }
 0x267   : > { %v756_v30 = vsel %vm452_vm2, %v750_v25, -inf }
 0x268   : > { %757 = vmax.xlane.f32.xlu0 %v756_v30  ;;  %v759_v34 = vsel %vm452_vm2, %v751_v29, -inf }
 0x269   : > { %v745_v31 = vpop.f32.mrb[6].mxu1 }
 0x26a   : > { %v752_v32 = vmul.f32 0.35355338, %v745_v31  ;;  %v2634_v33 = vpop.f32.mrb[7].mxu1 }
 0x26c   : > { %760 = vmax.xlane.f32.xlu0 %v759_v34  ;;  %v762_v35 = vsel %vm452_vm2, %v752_v32, -inf  ;;  %v1106_v34 = vlaneseq }
 0x26d   : > { %763 = vmax.xlane.f32.xlu1 %v762_v35 }
 0x26e   : > { %v3364_v35 = vshrl.u32 %v1106_v34, 7 }
 0x27e   : > { %443 = vrot.lane.b32.xlu1 %v3266_v11, %s3660_s25  ;;  %s3681_s25 = smov 8  }
 0x282   : > { %440 = vrot.lane.b32.xlu0 %v3266_v11, %s3659_s15  ;;  %s2521_s15 = sshll.u32 %s3134_s9, 7  ;;  %s2395_s9 = scalar_lea.sflag [#allocation4], %s3218_s13 }
 0x2f1   : > { %v755_v36 = vpop.xlane.xlu1 %754 }
 0x2f2   : > { %v765_v37 = vsub.f32 %v749_v21, %v755_v36  ;;  %v1108_v36 = vsub.s32 0, %v3364_v35 }
 0x2f4   : > { %v769_v38 = vmul.f32 1.442695, %v765_v37  ;;  %v3370_v37 = vld [vmem:[%s3653_s7] sm:$0x3f] }
 0x2f5   : > { %v758_v39 = vpop.xlane.xlu0 %757 }
 0x2f6   : > { %2911 = vpow2.f32 %v769_v38  ;;  %v766_v40 = vsub.f32 %v750_v25, %v758_v39  ;;  %v3373_v38 = vrot.slane %v3370_v37, %v1108_v36 }
 0x2f8   : > { %v771_v41 = vmul.f32 1.442695, %v766_v40 }
 0x2f9   : > { %v761_v42 = vpop.xlane.xlu0 %760 }
 0x2fa   : > { %2913 = vpow2.f32 %v771_v41  ;;  %v767_v43 = vsub.f32 %v751_v29, %v761_v42  ;;  %v764_v44 = vpop.xlane.xlu1 %763 }
 0x2fb   : > { %v768_v45 = vsub.f32 %v752_v32, %v764_v44 }
 0x2fc   : > { %v773_v46 = vmul.f32 1.442695, %v767_v43 }
 0x2fd   : > { %v775_v47 = vmul.f32 1.442695, %v768_v45  ;;  %v441_v48 = vpop.permute.xlu0 %440 }
 0x2fe   : > { %2915 = vpow2.f32 %v773_v46  ;;  %2636 = vmatpush3.msra.mxu0 %v441_v48  ;;  %v444_v49 = vpop.permute.xlu1 %443 }
 0x2ff   : > { %2917 = vpow2.f32 %v775_v47  ;;  %2641 = vmatpush3.msra.mxu1 %v444_v49  ;;  %2645 = vmatprep.subr.mxu0 %v3052_v1  ;;  %v330_v49 = vld [vmem:[%s3650_s4] sm:$0xff] }
 0x300   : > { %v2912_v50 = vpop.eup %2911  ;;  %2650 = vmatprep.subr.mxu1 %v3052_v1 }
 0x301   : > { %v777_v51 = vsel %vm452_vm2, %v2912_v50, 0.0 }
 0x302   : > { %778 = vadd.xlane.f32.xlu0 %v777_v51 }
 0x304   : > { %v2914_v52 = vpop.eup %2913 }
 0x305   : > { %v780_v53 = vsel %vm452_vm2, %v2914_v52, 0.0 }
 0x306   : > { %781 = vadd.xlane.f32.xlu1 %v780_v53 }
 0x308   : > { %v2916_v54 = vpop.eup %2915 }
 0x309   : > { %v2918_v55 = vpop.eup %2917  ;;  %v783_v56 = vsel %vm452_vm2, %v2916_v54, 0.0 }
 0x30a   : > { %784 = vadd.xlane.f32.xlu0 %v783_v56  ;;  %v786_v57 = vsel %vm452_vm2, %v2918_v55, 0.0  ;;  %v337_v56 = vld [vmem:[%s3652_s6 + $0x10] sm:$0xff] }
 0x30b   : > { %787 = vadd.xlane.f32.xlu1 %v786_v57 }
 0x31c   : > { %446 = vrot.lane.b32.xlu1 %v3266_v11, %s3658_s20  ;;  %s3684_s20 = sshll.u32 %s3218_s13, 3 }
 0x320   : > { %449 = vrot.lane.b32.xlu0 %v3266_v11, %s3657_s22  ;;  %s3674_s22 = smov 104  }
 0x38f   : > { %v779_v58 = vpop.xlane.xlu0 %778 }
 0x390   : > { %2919 = vrcp.f32 %v779_v58  ;;  %v338_v58 = vld [vmem:[%s3652_s6 + $0x18] sm:$0xff] }
 0x393   : > { %v782_v59 = vpop.xlane.xlu1 %781 }
 0x394   : > { %2921 = vrcp.f32 %v782_v59  ;;  %v3414_v59 = vpack.c.bf16 %v338_v58, %v337_v56 }
 0x397   : > { %v785_v60 = vpop.xlane.xlu0 %784 }
 0x398   : > { %2923 = vrcp.f32 %v785_v60  ;;  %v788_v61 = vpop.xlane.xlu1 %787  ;;  %v339_v60 = vld [vmem:[%s3652_s6 + $0x20] sm:$0xff] }
 0x399   : > { %2925 = vrcp.f32 %v788_v61  ;;  %v340_v61 = vld [vmem:[%s3652_s6 + $0x28] sm:$0xff] }
 0x39a   : > { %v2920_v62 = vpop.eup %2919 }
 0x39b   : > { %v793_v63 = vmul.f32 %v2920_v62, %v2912_v50  ;;  %v450_v6 = vpop.permute.xlu0 %449  ;;  %v331_v50 = vld [vmem:[%s3650_s4 + $0x8] sm:$0xff]  ;;  %v3424_v62 = vpack.c.bf16 %v340_v61, %v339_v60 }
 0x39c   : > { %v447_v2 = vpop.permute.xlu1 %446  ;;  %v3385_v51 = vpack.c.bf16 %v331_v50, %v330_v49 }
 0x39d   : > { %2638 = vmatmul.mubr.msk.f32.vlgmr.msra.gmra.mrb[2].mxu0 %vm452_vm2, %v793_v63 }
 0x39e   : > { %v2922_v3 = vpop.eup %2921  ;;  %2646 = vmatpush3.msra.mxu0 %v447_v2  ;;  %2647 = vmatprep.mubr.msk.f32.mxu0 %vm3051_vm0, %v3052_v1 }
 0x39f   : > { %v794_v4 = vmul.f32 %v2922_v3, %v2914_v52  ;;  %2794 = vmatprep.subr.bf16.mxu0 %v3050_v0  ;;  %v333_v52 = vld [vmem:[%s3650_s4 + $0x18] sm:$0xff] }
 0x3a1   : > { %2643 = vmatmul.mubr.msk.f32.vlgmr.msra.gmra.mrb[8].mxu1 %vm452_vm2, %v794_v4  ;;  %v1200_v4 = vsub.s32 2, %v3364_v35 }
 0x3a2   : > { %v2924_v10 = vpop.eup %2923  ;;  %2651 = vmatpush3.msra.mxu1 %v450_v6  ;;  %2652 = vmatprep.mubr.msk.f32.mxu1 %vm3051_vm0, %v3052_v1  ;;  %v1205_v6 = vsub.s32 3, %v3364_v35 }
 0x3a3   : > { %v2926_v11 = vpop.eup %2925  ;;  %v795_v12 = vmul.f32 %v2924_v10, %v2916_v54  ;;  %2800 = vmatprep.subr.bf16.mxu1 %v3050_v0  ;;  %v335_v54 = vld [vmem:[%s3652_s6] sm:$0xff]  ;;  %v3432_v10 = vrot.slane %v3370_v37, %v1200_v4 }
 0x3a4   : > { %v796_v13 = vmul.f32 %v2926_v11, %v2918_v55  ;;  %v336_v55 = vld [vmem:[%s3652_s6 + $0x8] sm:$0xff] }
 0x3a5   : > { %2648 = vmatmul.mubr.msk.f32.vlgmr.msra.gmra.mrb[4].mxu0 %vm452_vm2, %v795_v12  ;;  %v3408_v57 = vpack.c.bf16 %v336_v55, %v335_v54 }
 0x3a6   : > { %2653 = vmatmul.mubr.msk.f32.vlgmr.msra.gmra.mrb[10].mxu1 %vm452_vm2, %v796_v13  ;;  %2663 = vmatprep.mubr.msk.f32.mxu0 %vm3051_vm0, %v3052_v1  ;;  %v3435_v13 = vrot.slane %v3370_v37, %v1205_v6 }
 0x3a7   : > { %2674 = vmatprep.mubr.msk.f32.mxu1 %vm3051_vm0, %v3052_v1  ;;  %2796 = vmatpush3.bf16.msra.mxu0 %v3341_v16 }
 0x3a8   : > { %2797 = vmatprep.subr.bf16.mxu0 %v3050_v0  ;;  %2802 = vmatpush3.bf16.msra.mxu1 %v3385_v51 }
 0x3a9   : > { %2803 = vmatprep.subr.bf16.mxu1 %v3050_v0 }
 0x3ab   : > { %2799 = vmatpush3.bf16.msra.mxu0 %v3351_v19 }
 0x3ac   : > { %2806 = vmatprep.subr.bf16.mxu0 %v3050_v0 }
 0x470   : > { %v866_v20 = vpop.f32.mrb[2].mxu0 }
 0x471   : > { %v2639_v21 = vpop.f32.mrb[3].mxu0 }
 0x474   : > { %v939_v22 = vpop.f32.mrb[8].mxu1 }
 0x475   : > { %1090 = vrot.lane.b32.xlu1 %v939_v22, %s3666_s21  ;;  %v2644_v23 = vpop.f32.mrb[9].mxu1  ;;  %s3682_s21 = smov 24  }
 0x478   : > { %v1012_v24 = vpop.f32.mrb[4].mxu0 }
 0x479   : > { %1094 = vrot.lane.b32.xlu0 %v1012_v24, %s3664_s16  ;;  %v2649_v25 = vpop.f32.mrb[5].mxu0  ;;  %v1085_v26 = vpop.f32.mrb[10].mxu1  ;;  %v1290_v24 = vsub.s32 1, %v3364_v35  ;;  %s3676_s16 = smov 112  }
 0x47a   : > { %1098 = vrot.lane.b32.xlu1 %v1085_v26, %s3665_s26  ;;  %v2654_v27 = vpop.f32.mrb[11].mxu1  ;;  %s3683_s26 = smov 16  }
 0x47b   : > { %v3467_v25 = vrot.slane %v3370_v37, %v1290_v24 }
 0x4e7   : > { %v1091_v28 = vpop.permute.xlu1 %1090 }
 0x4e8   : > { %v1101_v29 = vsel %vm452_vm2, %v866_v20, %v1091_v28  ;;  %v3452_v20 = vpack.c.bf16 %v342_v18, %v341_v17 }
 0x4eb   : > { %v1095_v30 = vpop.permute.xlu0 %1094 }
 0x4ec   : > { %v1103_v31 = vsel %vm1102_vm3, %v1101_v29, %v1095_v30  ;;  %v1099_v32 = vpop.permute.xlu1 %1098 }
 0x4ed   : > { %v1105_v33 = vsel %vm1104_vm4, %v1103_v31, %v1099_v32 }
 0x4ee   : > { %2664 = vmatmul.mubr.msk.f32.vlgmr.msra.gmra.mrb[6].mxu0 %vm351_vm1, %v1105_v33 }
 0x4ef   : > { %2693 = vmatprep.mubr.msk.f32.mxu0 %vm3051_vm0, %v3052_v1  ;;  %2808 = vmatpush3.bf16.msra.mxu0 %v3408_v57 }
 0x4f0   : > { %2809 = vmatprep.subr.bf16.mxu0 %v3050_v0 }
 0x4f3   : > { %2811 = vmatpush3.bf16.msra.mxu0 %v3414_v59 }
 0x4f4   : > { %2812 = vmatprep.subr.bf16.mxu0 %v3050_v0 }
 0x4f7   : > { %2814 = vmatpush3.bf16.msra.mxu0 %v3424_v62 }
 0x4f8   : > { %2815 = vmatprep.subr.bf16.mxu0 %v3050_v0 }
 0x4fb   : > { %2817 = vmatpush3.bf16.msra.mxu0 %v3452_v20 }
 0x4fc   : > { %2717 = vmatprep.subr.mxu0 %v3052_v1 }
 0x5c1   : > { %v1179_v39 = vpop.f32.mrb[6].mxu0 }
 0x5c2   : > { %v1180_v40 = vadd.f32 %v1179_v39, %v3373_v38  ;;  %v2665_v41 = vpop.f32.mrb[7].mxu0 }
 0x5c4   : > { %v1183_v42 = vadd.f32 %v1180_v40, %v3253_v8  ;;  %v332_v8 = vld [vmem:[%s3650_s4 + $0x10] sm:$0xff] }
 0x5c5   : > { %v3395_v53 = vpack.c.bf16 %v333_v52, %v332_v8 }
 0x5c6   : > { %v1184_v43 = vsel %vm351_vm1, %v1183_v42, 0.0 }
 0x5c7   : > { %1185 = vadd.xlane.f32.xlu0 %v1184_v43  ;;  %2805 = vmatpush3.bf16.msra.mxu1 %v3395_v53  ;;  %v1387_v43 = vsub.s32 5, %v3364_v35 }
 0x5c8   : > { %2818 = vmatprep.subr.bf16.mxu1 %v3050_v0 }
 0x654   : > { %v1186_v44 = vpop.xlane.xlu0 %1185 }
 0x655   : > { %v1188_v45 = vmul.f32 0.03125, %v1186_v44 }
 0x657   : > { %v1189_v46 = vsub.f32 %v1183_v42, %v1188_v45  ;;  %v1382_v42 = vsub.s32 4, %v3364_v35 }
 0x659   : > { %v1190_v47 = vmul.f32 %v1189_v46, %v1189_v46  ;;  %v3475_v44 = vrot.slane %v3370_v37, %v1382_v42 }
 0x65b   : > { %v1191_v48 = vsel %vm351_vm1, %v1190_v47, 0.0  ;;  %v3478_v47 = vrot.slane %v3370_v37, %v1387_v43 }
 0x65c   : > { %1192 = vadd.xlane.f32.xlu1 %v1191_v48 }
 0x6e9   : > { %v1193_v63 = vpop.xlane.xlu1 %1192 }
 0x6ea   : > { %v1194_v2 = vmul.f32 0.03125, %v1193_v63 }
 0x6ec   : > { %v1195_v3 = vadd.f32 1e-05, %v1194_v2 }
 0x6ee   : > { %2927 = vrsqrt.f32 %v1195_v3 }
 0x6f8   : > { %v2928_v11 = vpop.eup %2927 }
 0x6f9   : > { %v1197_v12 = vmul.f32 %v2928_v11, %v1189_v46 }
 0x6fb   : > { %v1202_v14 = vmul.f32 %v3432_v10, %v1197_v12 }
 0x6fd   : > { %v1207_v15 = vadd.f32 %v3435_v13, %v1202_v14 }
 0x6ff   : > { %2675 = vmatmul.mubr.msk.f32.vlgmr.msra.gmra.mrb[12].mxu1 %vm351_vm1, %v1207_v15 }
 0x700   : > { %2820 = vmatpush3.bf16.msra.mxu1 %v3243_v5  ;;  %2704 = vmatprep.mubr.msk.f32.mxu1 %vm3051_vm0, %v3052_v1  ;;  %v3459_v5 = vld [vmem:[%s3651_s5] ss:$0 sm:$0xff] }
 0x701   : > { %2821 = vmatprep.subr.bf16.mxu1 %v3050_v0 }
 0x704   : > { %2823 = vmatpush3.bf16.msra.mxu1 %v3249_v7 }
 0x705   : > { %2707 = vmatprep.subr.mxu1 %v3052_v1 }
 0x7d2   : > { %v1283_v7 = vpop.f32.mrb[12].mxu1 }
 0x7d3   : > { %v1284_v21 = vadd.f32 %v3459_v5, %v1283_v7  ;;  %v2676_v22 = vpop.f32.mrb[13].mxu1 }
 0x7d5   : > { %v1287_v23 = vmax.f32 %v1284_v21, 0.0 }
 0x7d7   : > { %2694 = vmatmul.mubr.msk.f32.vlgmr.msra.gmra.mrb[8].mxu0 %vm1292_vm5, %v1287_v23 }
 0x7d8   : > { %2719 = vmatprep.mubr.msk.f32.mxu0 %vm3051_vm0, %v3052_v1 }
 0x8aa   : > { %v1362_v26 = vpop.f32.mrb[8].mxu0 }
 0x8ab   : > { %v1363_v27 = vadd.f32 %v1362_v26, %v3467_v25  ;;  %v2695_v28 = vpop.f32.mrb[9].mxu0 }
 0x8ad   : > { %v1366_v29 = vadd.f32 %v1363_v27, %v1207_v15 }
 0x8af   : > { %v1367_v30 = vsel %vm351_vm1, %v1366_v29, 0.0 }
 0x8b0   : > { %1368 = vadd.xlane.f32.xlu0 %v1367_v30 }
 0x93d   : > { %v1369_v31 = vpop.xlane.xlu0 %1368 }
 0x93e   : > { %v1370_v32 = vmul.f32 0.03125, %v1369_v31 }
 0x940   : > { %v1371_v33 = vsub.f32 %v1366_v29, %v1370_v32 }
 0x942   : > { %v1372_v34 = vmul.f32 %v1371_v33, %v1371_v33 }
 0x944   : > { %v1373_v36 = vsel %vm351_vm1, %v1372_v34, 0.0 }
 0x945   : > { %1374 = vadd.xlane.f32.xlu0 %v1373_v36 }
 0x9d2   : > { %v1375_v39 = vpop.xlane.xlu0 %1374 }
 0x9d3   : > { %v1376_v40 = vmul.f32 0.03125, %v1375_v39 }
 0x9d5   : > { %v1377_v41 = vadd.f32 1e-05, %v1376_v40 }
 0x9d7   : > { %2929 = vrsqrt.f32 %v1377_v41 }
 0x9e1   : > { %v2930_v45 = vpop.eup %2929 }
 0x9e2   : > { %v1379_v46 = vmul.f32 %v2930_v45, %v1371_v33 }
 0x9e4   : > { %v1384_v48 = vmul.f32 %v3475_v44, %v1379_v46 }
 0x9e6   : > { %v3482_v49 = vadd.f32 %v3478_v47, %v1384_v48 }
 0x9e8   : > { %2705 = vmatmul.mubr.msk.f32.vlgmr.msra.gmra.mrb[14].mxu1 %vm351_vm1, %v3482_v49 }
 0x9e9   : > { %2709 = vmatprep.mubr.msk.f32.mxu1 %vm3051_vm0, %v3052_v1 }
 0xabb   : > { %v1459_v35 = vpop.f32.mrb[14].mxu1 }
 0xabc   : > { %v3489_v50 = vadd.f32 %v3263_v9, %v1459_v35  ;;  %v2706_v8 = vpop.f32.mrb[15].mxu1 }
 0xabe   : > { %1472 = vrot.lane.b32.xlu0 %v3489_v50, %s3056_s12  ;;  %1470 = vrot.lane.b32.xlu1 %v3489_v50, %s3054_s24  ;;  %s3678_s24 = smov 64   ;;  %s3679_s12 = smov 48  }
 0xac2   : > { %1476 = vrot.lane.b32.xlu0 %v3489_v50, %s3058_s23  ;;  %1464 = vrot.lane.b32.xlu1 %v3489_v50, %s3053_s10  ;;  %s3677_s10 = smov 56   ;;  %s3680_s23 = smov 40  }
 0xac6   : > { %1468 = vrot.lane.b32.xlu0 %v3489_v50, %s3674_s22  ;;  %1474 = vrot.lane.b32.xlu1 %v3489_v50, %s3675_s19  ;;  %s320_s22 = scalar_lea.vmem [#allocation5], %s3684_s20 }
 0xac7   : > { %s2408_s19 = sshll.u32 %s320_s22, 4  ;;  %s3603_s19 = int_to_ptr.vmem [resolvable:$true] %s2408_s19 }
 0xaca   : > { %1466 = vrot.lane.b32.xlu1 %v3489_v50, %s3676_s16 }
 0xb30   : > { %v1473_v9 = vpop.permute.xlu0 %1472  ;;  %v1471_v37 = vpop.permute.xlu1 %1470 }
 0xb31   : > { %2708 = vmatpush3.xpose.msk.msra.mxu1 %vm452_vm2, %v1471_v37 }
 0xb32   : > { %2712 = vmatprep.subr.mxu1 %v3052_v1 }
 0xb34   : > { %2710 = vmatmul.mubr.msk.f32.vlgmr.msra.gmra.mrb[16].mxu1 %vm452_vm2, %v3489_v50  ;;  %v1465_v52 = vpop.permute.xlu1 %1464  ;;  %v1477_v54 = vpop.permute.xlu0 %1476 }
 0xb35   : > { %2713 = vmatpush3.xpose.msk.msra.mxu1 %vm452_vm2, %v1473_v9  ;;  %2714 = vmatprep.mubr.msk.f32.mxu1 %vm3051_vm0, %v3052_v1 }
 0xb36   : > { %2722 = vmatprep.subr.mxu1 %v3052_v1 }
 0xb38   : > { %2715 = vmatmul.mubr.msk.f32.vlgmr.msra.gmra.mrb[18].mxu1 %vm452_vm2, %v1465_v52  ;;  %v1475_v55 = vpop.permute.xlu1 %1474  ;;  %v1469_v56 = vpop.permute.xlu0 %1468 }
 0xb39   : > { %2718 = vmatpush3.xpose.msk.msra.mxu0 %vm452_vm2, %v1475_v55  ;;  %2723 = vmatpush3.xpose.msk.msra.mxu1 %vm452_vm2, %v1477_v54 }
 0xb3a   : > { %2724 = vmatprep.mubr.msk.f32.mxu1 %vm3051_vm0, %v3052_v1  ;;  %2732 = vmatprep.subr.mxu1 %v3052_v1 }
 0xb3b   : > { %2727 = vmatprep.subr.mxu0 %v3052_v1 }
 0xb3c   : > { %2725 = vmatmul.mubr.msk.f32.vlgmr.msra.gmra.mrb[20].mxu1 %vm452_vm2, %v1469_v56  ;;  %v1467_v58 = vpop.permute.xlu1 %1466 }
 0xb3d   : > { %2720 = vmatmul.mubr.msk.f32.vlgmr.msra.gmra.mrb[10].mxu0 %vm452_vm2, %v1467_v58  ;;  %2734 = vmatprep.mubr.msk.f32.mxu1 %vm3051_vm0, %v3052_v1 }
 0xb3e   : > { %2729 = vmatprep.mubr.msk.f32.mxu0 %vm3051_vm0, %v3052_v1 }
 0xc07   : > { %v1560_v60 = vpop.f32.mrb[16].mxu1 }
 0xc08   : > { %v1786_v61 = vmul.f32 0.35355338, %v1560_v60  ;;  %v2711_v63 = vpop.f32.mrb[17].mxu1 }
 0xc0a   : > { %v1790_v2 = vsel %vm452_vm2, %v1786_v61, -inf }
 0xc0b   : > { %1791 = vmax.xlane.f32.xlu1 %v1790_v2  ;;  %v1634_v3 = vpop.f32.mrb[18].mxu1 }
 0xc0c   : > { %v1787_v4 = vmul.f32 0.35355338, %v1634_v3  ;;  %v2716_v6 = vpop.f32.mrb[19].mxu1 }
 0xc0e   : > { %v1793_v11 = vsel %vm452_vm2, %v1787_v4, -inf }
 0xc0f   : > { %1794 = vmax.xlane.f32.xlu0 %v1793_v11  ;;  %v1782_v12 = vpop.f32.mrb[20].mxu1 }
 0xc10   : > { %v1789_v14 = vmul.f32 0.35355338, %v1782_v12  ;;  %v1708_v15 = vpop.f32.mrb[10].mxu0  ;;  %v2726_v17 = vpop.f32.mrb[21].mxu1 }
 0xc11   : > { %v1788_v18 = vmul.f32 0.35355338, %v1708_v15  ;;  %v2721_v7 = vpop.f32.mrb[11].mxu0 }
 0xc12   : > { %v1799_v21 = vsel %vm452_vm2, %v1789_v14, -inf }
 0xc13   : > { %1800 = vmax.xlane.f32.xlu1 %v1799_v21  ;;  %v1796_v22 = vsel %vm452_vm2, %v1788_v18, -inf }
 0xc14   : > { %1797 = vmax.xlane.f32.xlu0 %v1796_v22 }
 0xc24   : > { %1481 = vrot.lane.b32.xlu1 %v3489_v50, %s3677_s10 }
 0xc2a   : > { %1478 = vrot.lane.b32.xlu0 %v3489_v50, %s3678_s24  ;;  %s3601_s24 = scalar_lea.hbm %s3654_s8, %s2521_s15 }
 0xc98   : > { %v1792_v23 = vpop.xlane.xlu1 %1791 }
 0xc99   : > { %v1802_v24 = vsub.f32 %v1786_v61, %v1792_v23 }
 0xc9b   : > { %v1806_v26 = vmul.f32 1.442695, %v1802_v24 }
 0xc9c   : > { %v1795_v27 = vpop.xlane.xlu0 %1794 }
 0xc9d   : > { %2931 = vpow2.f32 %v1806_v26  ;;  %v1803_v28 = vsub.f32 %v1787_v4, %v1795_v27 }
 0xc9f   : > { %v1808_v29 = vmul.f32 1.442695, %v1803_v28 }
 0xca0   : > { %v1801_v30 = vpop.xlane.xlu1 %1800 }
 0xca1   : > { %2933 = vpow2.f32 %v1808_v29  ;;  %v1805_v31 = vsub.f32 %v1789_v14, %v1801_v30  ;;  %v1798_v32 = vpop.xlane.xlu0 %1797 }
 0xca2   : > { %v1804_v33 = vsub.f32 %v1788_v18, %v1798_v32 }
 0xca3   : > { %v1812_v34 = vmul.f32 1.442695, %v1805_v31 }
 0xca4   : > { %v1810_v36 = vmul.f32 1.442695, %v1804_v33  ;;  %v1482_v39 = vpop.permute.xlu1 %1481 }
 0xca5   : > { %2935 = vpow2.f32 %v1812_v34  ;;  %v1479_v40 = vpop.permute.xlu0 %1478  ;;  %2733 = vmatpush3.msra.mxu1 %v1482_v39 }
 0xca6   : > { %2937 = vpow2.f32 %v1810_v36  ;;  %2728 = vmatpush3.msra.mxu0 %v1479_v40  ;;  %2742 = vmatprep.subr.mxu1 %v3052_v1 }
 0xca7   : > { %v2932_v41 = vpop.eup %2931  ;;  %2737 = vmatprep.subr.mxu0 %v3052_v1 }
 0xca8   : > { %v1814_v42 = vsel %vm452_vm2, %v2932_v41, 0.0 }
 0xca9   : > { %1815 = vadd.xlane.f32.xlu0 %v1814_v42 }
 0xcab   : > { %v2934_v43 = vpop.eup %2933 }
 0xcac   : > { %v1817_v45 = vsel %vm452_vm2, %v2934_v43, 0.0 }
 0xcad   : > { %1818 = vadd.xlane.f32.xlu1 %v1817_v45 }
 0xcaf   : > { %v2936_v46 = vpop.eup %2935 }
 0xcb0   : > { %v2938_v48 = vpop.eup %2937  ;;  %v1823_v35 = vsel %vm452_vm2, %v2936_v46, 0.0 }
 0xcb1   : > { %1824 = vadd.xlane.f32.xlu1 %v1823_v35  ;;  %v1820_v8 = vsel %vm452_vm2, %v2938_v48, 0.0 }
 0xcb2   : > { %1821 = vadd.xlane.f32.xlu0 %v1820_v8 }
 0xcc2   : > { %1484 = vrot.lane.b32.xlu1 %v3489_v50, %s3679_s12  ;;  %s2981_s12 = scalar_lea.vmem %s3603_s19, 128 }
 0xcc3   : > { %p2982_p6 = scmp.ne.s32.totalorder %s3603_s19, %s2981_s12 }
 0xcc5   : > { %p2983_p12 = pnand %p2982_p6, %p3685_p11 }
 0xcc7   : > { %p2984_p13 = pneg %p2983_p12 }
 0xcc8   : > { %1487 = vrot.lane.b32.xlu0 %v3489_v50, %s3680_s23  ;;  %s3067_s23 = smov [#allocation5]  }
 0xd36   : > { %v1816_v9 = vpop.xlane.xlu0 %1815 }
 0xd37   : > { %2939 = vrcp.f32 %v1816_v9 }
 0xd3a   : > { %v1819_v37 = vpop.xlane.xlu1 %1818 }
 0xd3b   : > { %2941 = vrcp.f32 %v1819_v37 }
 0xd3e   : > { %v1825_v52 = vpop.xlane.xlu1 %1824 }
 0xd3f   : > { %2943 = vrcp.f32 %v1825_v52  ;;  %v1822_v54 = vpop.xlane.xlu0 %1821 }
 0xd40   : > { %2945 = vrcp.f32 %v1822_v54 }
 0xd41   : > { %v2940_v55 = vpop.eup %2939 }
 0xd42   : > { %v1830_v56 = vmul.f32 %v2940_v55, %v2932_v41  ;;  %v1485_v58 = vpop.permute.xlu1 %1484 }
 0xd43   : > { %v1488_v50 = vpop.permute.xlu0 %1487 }
 0xd44   : > { %2730 = vmatmul.mubr.msk.f32.vlgmr.msra.gmra.mrb[12].mxu0 %vm452_vm2, %v1830_v56 }
 0xd45   : > { %v2942_v60 = vpop.eup %2941  ;;  %2738 = vmatpush3.msra.mxu0 %v1485_v58  ;;  %2739 = vmatprep.mubr.msk.f32.mxu0 %vm3051_vm0, %v3052_v1 }
 0xd46   : > { %v1831_v61 = vmul.f32 %v2942_v60, %v2934_v43  ;;  %2824 = vmatprep.subr.bf16.mxu0 %v3050_v0 }
 0xd48   : > { %2735 = vmatmul.mubr.msk.f32.vlgmr.msra.gmra.mrb[22].mxu1 %vm452_vm2, %v1831_v61 }
 0xd49   : > { %v2944_v63 = vpop.eup %2943  ;;  %2743 = vmatpush3.msra.mxu1 %v1488_v50  ;;  %2744 = vmatprep.mubr.msk.f32.mxu1 %vm3051_vm0, %v3052_v1 }
 0xd4a   : > { %v2946_v2 = vpop.eup %2945  ;;  %v1833_v3 = vmul.f32 %v2944_v63, %v2936_v46  ;;  %2830 = vmatprep.subr.bf16.mxu1 %v3050_v0 }
 0xd4b   : > { %v1832_v4 = vmul.f32 %v2946_v2, %v2938_v48 }
 0xd4c   : > { %2745 = vmatmul.mubr.msk.f32.vlgmr.msra.gmra.mrb[24].mxu1 %vm452_vm2, %v1833_v3 }
 0xd4d   : > { %2740 = vmatmul.mubr.msk.f32.vlgmr.msra.gmra.mrb[14].mxu0 %vm452_vm2, %v1832_v4  ;;  %2832 = vmatpush3.bf16.msra.mxu1 %v3385_v51 }
 0xd4e   : > { %2826 = vmatpush3.bf16.msra.mxu0 %v3341_v16  ;;  %2755 = vmatprep.mubr.msk.f32.mxu0 %vm3051_vm0, %v3052_v1 }
 0xd4f   : > { %2827 = vmatprep.subr.bf16.mxu0 %v3050_v0  ;;  %2833 = vmatprep.subr.bf16.mxu1 %v3050_v0 }
 0xd50   : > { %2766 = vmatprep.mubr.msk.f32.mxu1 %vm3051_vm0, %v3052_v1 }
 0xd51   : > { %2835 = vmatpush3.bf16.msra.mxu1 %v3395_v53 }
 0xd52   : > { %2829 = vmatpush3.bf16.msra.mxu0 %v3351_v19 }
 0xd53   : > { %2836 = vmatprep.subr.bf16.mxu0 %v3050_v0 }
 0xe17   : > { %v1903_v6 = vpop.f32.mrb[12].mxu0 }
 0xe18   : > { %v2731_v51 = vpop.f32.mrb[13].mxu0 }
 0xe1b   : > { %v1976_v11 = vpop.f32.mrb[22].mxu1 }
 0xe1c   : > { %2127 = vrot.lane.b32.xlu1 %v1976_v11, %s3681_s25  ;;  %v2736_v16 = vpop.f32.mrb[23].mxu1  ;;  %s2985_s25 = sshll.u32 %s3067_s23, 4  ;;  %s2986_s25 = int_to_ptr.vmem [resolvable:$false] %s2985_s25 }
 0xe1d   : > { %p2988_p7 = scmp.lt.s32.totalorder %s3603_s19, %s2986_s25 }
 0xe1f   : > { %v2122_v12 = vpop.f32.mrb[24].mxu1 }
 0xe20   : > { %v2049_v14 = vpop.f32.mrb[14].mxu0  ;;  %2135 = vrot.lane.b32.xlu1 %v2122_v12, %s3682_s21  ;;  %v2746_v15 = vpop.f32.mrb[25].mxu1  ;;  %s2987_s21 = scalar_lea.vmem %s2986_s25, 256 }
 0xe21   : > { %2131 = vrot.lane.b32.xlu0 %v2049_v14, %s3683_s26  ;;  %v2741_v17 = vpop.f32.mrb[15].mxu0  ;;  %p2989_p10 = scmp.lt.s32.totalorder %s2987_s21, %s2981_s12 }
 0xe23   : > { %p2990_p2 = por %p2989_p10, %p2988_p7 }
 0xe25   : > { %p2991_p4 = pnand %p2990_p2, %p2984_p13 }
 0xe8e   : > { %v2128_v18 = vpop.permute.xlu1 %2127 }
 0xe8f   : > { %v2138_v53 = vsel %vm452_vm2, %v1903_v6, %v2128_v18 }
 0xe92   : > { %v2136_v7 = vpop.permute.xlu1 %2135 }
 0xe93   : > { %v2132_v19 = vpop.permute.xlu0 %2131 }
 0xe94   : > { %v2139_v21 = vsel %vm1102_vm3, %v2138_v53, %v2132_v19 }
 0xe95   : > { %v2140_v22 = vsel %vm1104_vm4, %v2139_v21, %v2136_v7 }
 0xe96   : > { %2756 = vmatmul.mubr.msk.f32.vlgmr.msra.gmra.mrb[16].mxu0 %vm351_vm1, %v2140_v22 }
 0xe97   : > { %2838 = vmatpush3.bf16.msra.mxu0 %v3408_v57  ;;  %2785 = vmatprep.mubr.msk.f32.mxu0 %vm3051_vm0, %v3052_v1 }
 0xe98   : > { %2839 = vmatprep.subr.bf16.mxu0 %v3050_v0 }
 0xe9b   : > { %2841 = vmatpush3.bf16.msra.mxu0 %v3414_v59 }
 0xe9c   : > { %2842 = vmatprep.subr.bf16.mxu0 %v3050_v0 }
 0xe9f   : > { %2844 = vmatpush3.bf16.msra.mxu0 %v3424_v62 }
 0xea0   : > { %2845 = vmatprep.subr.bf16.mxu0 %v3050_v0 }
 0xea3   : > { %2847 = vmatpush3.bf16.msra.mxu0 %v3452_v20 }
 0xf69   : > { %v2210_v23 = vpop.f32.mrb[16].mxu0 }
 0xf6a   : > { %v2211_v24 = vadd.f32 %v2210_v23, %v3373_v38  ;;  %v2757_v26 = vpop.f32.mrb[17].mxu0 }
 0xf6c   : > { %v2214_v57 = vadd.f32 %v2211_v24, %v3482_v49 }
 0xf6e   : > { %v2215_v1 = vsel %vm351_vm1, %v2214_v57, 0.0 }
 0xf6f   : > { %2216 = vadd.xlane.f32.xlu0 %v2215_v1 }
 0xffc   : > { %v2217_v27 = vpop.xlane.xlu0 %2216 }
 0xffd   : > { %v2218_v28 = vmul.f32 0.03125, %v2217_v27 }
 0xfff   : > { %v2219_v59 = vsub.f32 %v2214_v57, %v2218_v28 }
0x1001   : > { %v2220_v29 = vmul.f32 %v2219_v59, %v2219_v59 }
0x1003   : > { %v2221_v30 = vsel %vm351_vm1, %v2220_v29, 0.0 }
0x1004   : > { %2222 = vadd.xlane.f32.xlu1 %v2221_v30 }
0x1091   : > { %v2223_v62 = vpop.xlane.xlu1 %2222 }
0x1092   : > { %v2224_v0 = vmul.f32 0.03125, %v2223_v62 }
0x1094   : > { %v2225_v31 = vadd.f32 1e-05, %v2224_v0 }
0x1096   : > { %2947 = vrsqrt.f32 %v2225_v31 }
0x10a0   : > { %v2948_v20 = vpop.eup %2947 }
0x10a1   : > { %v2227_v32 = vmul.f32 %v2948_v20, %v2219_v59 }
0x10a3   : > { %v2228_v38 = vmul.f32 %v2227_v32, %v3432_v10 }
0x10a5   : > { %v2229_v49 = vadd.f32 %v2228_v38, %v3435_v13 }
0x10a7   : > { %2767 = vmatmul.mubr.msk.f32.vlgmr.msra.gmra.mrb[26].mxu1 %vm351_vm1, %v2229_v49 }
0x117a   : > { %v2299_v33 = vpop.f32.mrb[26].mxu1 }
0x117b   : > { %v2300_v34 = vadd.f32 %v3459_v5, %v2299_v33  ;;  %v2768_v36 = vpop.f32.mrb[27].mxu1 }
0x117d   : > { %v2303_v39 = vmax.f32 %v2300_v34, 0.0 }
0x117f   : > { %2786 = vmatmul.mubr.msk.f32.vlgmr.msra.gmra.mrb[18].mxu0 %vm1292_vm5, %v2303_v39 }
0x1252   : > { %v2373_v40 = vpop.f32.mrb[18].mxu0 }
0x1253   : > { %v2374_v41 = vadd.f32 %v2373_v40, %v3467_v25  ;;  %v2787_v42 = vpop.f32.mrb[19].mxu0 }
0x1255   : > { %v2377_v43 = vadd.f32 %v2374_v41, %v2229_v49 }
0x1257   : > { %v2378_v10 = vsel %vm351_vm1, %v2377_v43, 0.0 }
0x1258   : > { %2379 = vadd.xlane.f32.xlu0 %v2378_v10 }
0x12e5   : > { %v2380_v13 = vpop.xlane.xlu0 %2379 }
0x12e6   : > { %v2381_v45 = vmul.f32 0.03125, %v2380_v13 }
0x12e8   : > { %v2382_v46 = vsub.f32 %v2377_v43, %v2381_v45 }
0x12ea   : > { %v2383_v48 = vmul.f32 %v2382_v46, %v2382_v46 }
0x12ec   : > { %v2384_v5 = vsel %vm351_vm1, %v2383_v48, 0.0 }
0x12ed   : > { %2385 = vadd.xlane.f32.xlu0 %v2384_v5 }
0x137a   : > { %v2386_v35 = vpop.xlane.xlu0 %2385 }
0x137b   : > { %v2387_v8 = vmul.f32 0.03125, %v2386_v35 }
0x137d   : > { %v2388_v9 = vadd.f32 1e-05, %v2387_v8 }
0x137f   : > { %2949 = vrsqrt.f32 %v2388_v9 }
0x1389   : > { %v2950_v25 = vpop.eup %2949 }
0x138a   : > { %v2390_v37 = vmul.f32 %v2950_v25, %v2382_v46 }
0x138c   : > { %v2391_v52 = vmul.f32 %v2390_v37, %v3475_v44 }
0x138e   : > { %v2392_v54 = vadd.f32 %v2391_v52, %v3478_v47 }
0x1390   : > { %2393 = vst.msk [vmem:[%s320_s22] sm:$0xff] %vm351_vm1, %v2392_v54 }
0x1391   : > { %2994 = shalt.err (!%p2991_p4)
}
0x1392   : > { %s2995_s13 = scalar_lea.hbm %s3601_s24, 128  ;;  %s2999_s20 = scalar_lea.hbm %s3654_s8, 256 }
0x1393   : > { %p2996_p5 = scmp.ne.s32.totalorder %s3601_s24, %s2995_s13  ;;  %p3000_p0 = scmp.lt.u32.totalorder %s3601_s24, %s3654_s8 }
0x1394   : > { %p3001_p1 = scmp.lt.u32.totalorder %s2999_s20, %s2995_s13  ;;  %p3003_p6 = scmp.lt.u32.totalorder %s2995_s13, %s3601_s24 }
0x1395   : > { %p2997_p8 = pnand %p2996_p5, %p3685_p11 }
0x1396   : > { %p3002_p3 = por %p3001_p1, %p3000_p0 }
0x1397   : > { %p2998_p9 = pneg %p2997_p8 }
0x1398   : > { %p3004_p12 = por %p3003_p6, %p3002_p3 }
0x139a   : > { %p3005_p13 = pnand %p3004_p12, %p2998_p9 }
0x139c   : > { %3008 = shalt.err (!%p3005_p13)
}
0x139d   : > { %2850 = dma.vmem_to_hbm [thread:$0]  (%p3685_p11), %s3603_s19, 128, %s3601_s24, %s2395_s9  }
0x139e PF: > { %s2420_s10 = sand.u32 1, %s3035_s27   ;;  %p3686_p7 = scmp.ne.s32.totalorder %s3670_s18, 0 }
0x139f   : > { %p3687_p10 = scmp.ge.s32.totalorder %s3047_s30, 2  ;;  %s2421_s12 = scalar_lea.sflag [#allocation4], %s2420_s10 }
0x13a1   : > { %p2857_p2 = pnand %p3687_p10, %p3686_p7 }
0x13a3   : > { %3030 = dma.done.wait (!%p2857_p2), %s2421_s12, 128  }
0x13a4   : > { %3032 = vsyncadd (!%p2857_p2), %s2421_s12, 4294967168  ;;  %p21_p4 = scmp.ge.s32.totalorder %s3138_s11, 4   ;;  %s3688_s27 = smov %s3039_s28 }
0x13a5   : > { %s3689_s28 = smov %s3043_s29  ;;  %s3690_s29 = smov %s3150_s14 }
0x13a6   : > { %s3691_s30 = smov %s3138_s11  ;;  %23 = sbr.rel (!%p21_p4) target bundleno = 5 (0x5), region = 97 }
0x13ad   :  { %2426 = vsyncpa [#allocation3], 1 }
0x13ae   :  { %2428 = vsyncpa [#allocation3 + $0x1], 1 }
0x13af   :  { %2429 = vsyncpa [#allocation4], 1 }
0x13b0   :  { %2431 = vsyncpa [#allocation4 + $0x1], 1 }

</bundles_post_ra>
